<compile_context>
chip_gen: v7x
topology: tpu7x:2x2x1
jax: 0.10.0
libtpu: 0.0.40
codegen_flags: <defaults>
</compile_context>

<pallas_src>
import functools
import math

import jax
import jax.numpy as jnp
from jax.experimental import pallas as pl
from jax.experimental.pallas import tpu as pltpu


def _round_up(x, m):
    return ((x + m - 1) // m) * m


def _cdiv(a, b):
    return -(-a // b)


def _gelu_exact(x):
    # PyTorch get_act_fn("gelu") is exact erf-GELU (not the tanh approximation).
    return 0.5 * x * (1.0 + jax.lax.erf(x * (1.0 / math.sqrt(2.0))))


# ------------------------- fused projector kernel --------------------------
def _projector_kernel(xm_ref, nw_ref, wm_ref, w1_ref, b1_ref, w2_ref, b2_ref,
                      o_ref, xn_ref, h_ref, *, s2, d, eps):
    """Fused RMSNorm + patch-merge matmul + linear_1 + GELU + linear_2 tile.

    Grid axis 0: row tiles ("parallel").  Grid axis 1: linear_2 output-feature
    tiles ("arbitrary"; a single step when w2 is fully resident).  The pre-GELU
    hidden activations for a row tile are computed once (j == 0) and stashed in
    VMEM scratch for the remaining j.
    """
    cdt = h_ref.dtype                      # MXU compute dtype (bf16 or f32)
    tm = xm_ref.shape[0]

    @pl.when(pl.program_id(1) == 0)
    def _():
        # Hoisted norm-weight broadcast (JAX does not CSE broadcast_in_dim).
        nw_b = jnp.broadcast_to(nw_ref[...].astype(jnp.float32), (tm, d))
        # Per original-patch-token RMSNorm in f32, chunk by chunk: the live f32
        # working set stays (tm, d) (no (tm, K) f32 spill slab); normalized
        # rows land in a compute-dtype scratch in token-contiguous order.
        for p in range(s2):
            chunk = xm_ref[:, p * d:(p + 1) * d].astype(jnp.float32)
            var = jnp.mean(chunk * chunk, axis=-1, keepdims=True)
            xn_ref[:, p * d:(p + 1) * d] = (
                chunk * jax.lax.rsqrt(var + eps) * nw_b).astype(cdt)
        # One long-K merge matmul (better MXU push/pop cadence than s2
        # accumulated partials), then linear_1 + exact-erf GELU.
        m = jnp.dot(xn_ref[...], wm_ref[...],
                    preferred_element_type=jnp.float32)
        h = jnp.dot(m.astype(cdt), w1_ref[...],
                    preferred_element_type=jnp.float32)
        h = _gelu_exact(h + b1_ref[...].astype(jnp.float32))
        h_ref[...] = h.astype(cdt)

    y = jnp.dot(h_ref[...], w2_ref[...], preferred_element_type=jnp.float32)
    o_ref[...] = (y + b2_ref[...].astype(jnp.float32)).astype(o_ref.dtype)


# ------------------- generation-aware tiling / VMEM plan -------------------
def _tpu_generation_info():
    """Best-effort (vmem_capacity_bytes, tensorcores_per_chip, gen_tag)."""
    vmem = None
    try:
        info = pltpu.get_tpu_info()
        vmem = int(getattr(info, "vmem_capacity_bytes", 0)) or None
    except Exception:
        pass
    kind = ""
    try:
        kind = jax.devices()[0].device_kind.lower()
    except Exception:
        pass
    if "v7" in kind:
        gen, cores, dflt = "v7x", 2, 64 * 2**20
    elif "v6" in kind:
        gen, cores, dflt = "v6e", 1, 128 * 2**20
    elif "v5" in kind and ("lite" in kind or "v5e" in kind):
        gen, cores, dflt = "v5e", 1, 128 * 2**20
    elif "v5" in kind or "v4" in kind:
        gen, cores, dflt = "v5p", 2, 128 * 2**20
    else:
        gen, cores, dflt = "unknown", 1, 64 * 2**20   # conservative fallback
    return (vmem or dflt), cores, gen


def _plan_tiles(M, K, D, H, *, in_bytes, out_bytes, cbytes, row_tile, col_tile,
                single_buffer_weights):
    vmem_cap, cores, gen = _tpu_generation_info()
    budget = int(vmem_cap * 0.80)

    if row_tile is None:
        # v5e: 4x128x128 MXU + lower HBM BW -> 128.  v7x streams w2 -> longer
        # row tiles halve the number of w2 re-streams.  v6e/v5p: 256.
        row_tile = {"v5e": 128, "v7x": 512}.get(gen, 256)

    # Row tile: limit padding waste (<= 8 dead rows per tile) and give every
    # TensorCore at least one row tile on multi-core parts (v7x megacore).
    min_tiles = cores if M >= cores * 64 else 1
    n_tiles = max(_cdiv(M, row_tile), min_tiles, 1)
    tm = min(_round_up(_cdiv(M, n_tiles), 8), _round_up(max(M, 1), 8))

    wbuf = 1 if single_buffer_weights else 2

    def est_bytes(tm_, tn):
        w2_bufs = wbuf if tn == H else 2
        return (wbuf * (K * D + D * H) * cbytes           # merge + linear_1 w
                + w2_bufs * H * tn * cbytes               # linear_2 w tile
                + (wbuf * H + w2_bufs * tn) * 4           # biases (f32)
                + 2 * tm_ * K * in_bytes                  # token slab (dbl buf)
                + 2 * tm_ * tn * out_bytes                # output tile (dbl buf)
                + tm_ * (K + H) * cbytes)                 # xn + hidden scratch

    if col_tile is None:
        if est_bytes(tm, H) <= budget:
            col_tile = H        # whole w2 resident -> fetched from HBM once
        else:
            col_tile = next((t for t in (512, 256, 128) if H % t == 0), H)
            while est_bytes(tm, col_tile) > budget and tm > 64:
                tm = max(64, _round_up(tm // 2, 8))
    assert H % col_tile == 0, (H, col_tile)

    M_pad = _round_up(max(M, 1), tm)
    vmem_limit = max(32 * 2**20, est_bytes(tm, col_tile) + 4 * 2**20)
    vmem_limit = min(vmem_limit, int(vmem_cap * 0.85))
    return tm, M_pad, col_tile, int(vmem_limit)


# ------------------------------ pallas_call --------------------------------
def _fused_projector(xm, norm_w, wm, w1, b1, w2, b2, *, out_dtype, eps,
                     row_tile, col_tile, vmem_limit, single_buffer_weights):
    M_pad, K = xm.shape
    D = wm.shape[1]
    H = w1.shape[1]
    d = norm_w.shape[-1]
    s2 = K // d
    tm, tn = row_tile, col_tile
    assert M_pad % tm == 0 and H % tn == 0 and K == s2 * d
    cdtype = wm.dtype
    cbytes = jnp.dtype(cdtype).itemsize

    def _const_spec(shape, index_map):
        # Constant-index weight operands never change block; a single buffer
        # halves their VMEM reservation (important at real Mistral3 sizes on
        # v7x).  Caller has a fallback for jax builds that reject Buffered(1).
        if single_buffer_weights:
            return pl.BlockSpec(shape, index_map, pipeline_mode=pl.Buffered(1))
        return pl.BlockSpec(shape, index_map)

    # Full-H column tile => w2/b2 have constant block indices, so they are
    # DMA'd from HBM exactly once (instead of once per row tile).
    if tn == H:
        w2_spec = _const_spec((H, H), lambda i, j: (0, 0))
        b2_spec = _const_spec((1, H), lambda i, j: (0, 0))
    else:
        w2_spec = pl.BlockSpec((H, tn), lambda i, j: (0, j))
        b2_spec = pl.BlockSpec((1, tn), lambda i, j: (0, j))

    cost = pl.CostEstimate(
        flops=int(2 * M_pad * (K * D + D * H + H * H)),
        transcendentals=int(M_pad * H),
        bytes_accessed=int(M_pad * K * xm.dtype.itemsize
                           + M_pad * H * jnp.dtype(out_dtype).itemsize
                           + (K * D + D * H + H * H) * cbytes),
    )

    kernel = functools.partial(_projector_kernel, s2=s2, d=d, eps=eps)
    return pl.pallas_call(
        kernel,
        out_shape=jax.ShapeDtypeStruct((M_pad, H), out_dtype),
        grid=(M_pad // tm, H // tn),
        in_specs=[
            pl.BlockSpec((tm, K), lambda i, j: (i, 0)),       # f32 token slab
            _const_spec((1, d), lambda i, j: (0, 0)),         # RMSNorm weight
            _const_spec((K, D), lambda i, j: (0, 0)),         # merge weight
            _const_spec((D, H), lambda i, j: (0, 0)),         # linear_1 weight
            _const_spec((1, H), lambda i, j: (0, 0)),         # linear_1 bias
            w2_spec,                                          # linear_2 weight
            b2_spec,                                          # linear_2 bias
        ],
        out_specs=pl.BlockSpec((tm, tn), lambda i, j: (i, j)),
        scratch_shapes=[pltpu.VMEM((tm, K), cdtype),          # normalized slab
                        pltpu.VMEM((tm, H), cdtype)],         # pre-GELU hidden
        compiler_params=pltpu.CompilerParams(
            dimension_semantics=("parallel", "arbitrary"),
            vmem_limit_bytes=int(vmem_limit),
        ),
        cost_estimate=cost,
    )(xm, norm_w, wm, w1, b1, w2, b2)


# ---------------------- PatchMerger rearrangement (glue) -------------------
def patch_merge_rearrange(image_features, image_sizes, patch_size, s):
    """torch.nn.functional.unfold(kernel=s, stride=s) on each image's token
    grid, emitted in token-contiguous feature order [(ki*s + kj) * d + c] so
    the per-patch RMSNorm inside the kernel reduces over contiguous lanes.
    The merging-layer weight is permuted to match in prepare_params().
    """
    # TODO(synk): the ragged per-image split/permute is data-dependent host
    # metadata; it stays as pure-JAX reshape/transpose glue (a permutation,
    # fused by XLA) rather than a Pallas kernel.
    d = image_features.shape[-1]
    pieces = []
    off = 0
    for (hp, wp) in image_sizes:
        h, w = hp // patch_size, wp // patch_size
        tok = image_features[off:off + h * w]
        off += h * w
        g = tok.reshape(h // s, s, w // s, s, d)      # (bi, ki, bj, kj, c)
        g = g.transpose(0, 2, 1, 3, 4)                # (bi, bj, ki, kj, c)
        pieces.append(g.reshape((h // s) * (w // s), s * s * d))
    return jnp.concatenate(pieces, axis=0)


# -------------------- one-time weight prep ("load time") -------------------
def prepare_params(pt_params, spatial_merge_size, compute_dtype=jnp.bfloat16):
    """Pre-transpose to (in, out), permute+flatten the merging-layer weight to
    the token-contiguous unfold ordering (K = s2*d rows, p-major), and pre-cast
    matmul weights to the MXU compute dtype.  Run once at weight-load time."""
    s2 = spatial_merge_size * spatial_merge_size
    wm = pt_params["wm"]                              # (d, d*s2), in = c*s2 + p
    d = wm.shape[0]
    # (d*s2, d) rows indexed c*s2+p -> (c, p, o) -> (p, c, o) -> (s2*d, d)
    wm_kd = wm.T.reshape(d, s2, d).transpose(1, 0, 2).reshape(s2 * d, d)
    H = pt_params["w1"].shape[0]
    # TODO(synk): optional fp8 pre-quant of w2 on v7x (halves DMA, 2x MXU rate)
    # when the accuracy budget allows; not enabled by default.
    return {
        "norm_w": pt_params["norm_w"].reshape(1, d).astype(jnp.float32),
        "wm": wm_kd.astype(compute_dtype),                     # (K, D)
        "w1": pt_params["w1"].T.astype(compute_dtype),         # (D, H)
        "b1": pt_params["b1"].reshape(1, H).astype(jnp.float32),
        "w2": pt_params["w2"].T.astype(compute_dtype),         # (H, H)
        "b2": pt_params["b2"].reshape(1, H).astype(jnp.float32),
    }


# ------------------------------- full forward ------------------------------
def mistral3_mm_projector(image_features, image_sizes, kparams, *, patch_size,
                          spatial_merge_size, eps=1e-5, row_tile=None,
                          col_tile=None, single_buffer_weights=True):
    # NOTE: eps must match the checkpoint config (the module hardcodes 1e-05).
    s = spatial_merge_size
    d = kparams["norm_w"].shape[-1]
    K, D = kparams["wm"].shape
    H = kparams["w1"].shape[1]
    cdtype = kparams["wm"].dtype

    xm = patch_merge_rearrange(image_features, image_sizes, patch_size, s)
    # Keep the token slab in f32: the in-kernel RMSNorm then matches the
    # PyTorch module exactly (full-precision variance); the cast to the MXU
    # compute dtype happens per chunk after the statistics.  Activation DMA is
    # small next to w2 traffic, so this costs essentially nothing.
    xm = xm.astype(jnp.float32)
    M = xm.shape[0]

    tm, M_pad, tn, vmem_limit = _plan_tiles(
        M, K, D, H,
        in_bytes=4,
        out_bytes=jnp.dtype(image_features.dtype).itemsize,
        cbytes=jnp.dtype(cdtype).itemsize,
        row_tile=row_tile, col_tile=col_tile,
        single_buffer_weights=single_buffer_weights)

    if M_pad != M:
        xm = jnp.pad(xm, ((0, M_pad - M), (0, 0)))

    call = functools.partial(
        _fused_projector, xm, kparams["norm_w"], kparams["wm"], kparams["w1"],
        kparams["b1"], kparams["w2"], kparams["b2"],
        out_dtype=image_features.dtype, eps=eps,
        row_tile=tm, col_tile=tn, vmem_limit=vmem_limit)
    try:
        out = call(single_buffer_weights=single_buffer_weights)
    except Exception:
        if not single_buffer_weights:
            raise
        # Fallback for jax builds that reject pipeline_mode=pl.Buffered(1).
        out = call(single_buffer_weights=False)
    return out[:M]


# ------------------------------ plain-JAX ref -------------------------------
def _reference(image_features, image_sizes, pt_params, patch_size, s, eps=1e-5):
    """Direct transcription of the PyTorch module (channel-major unfold)."""
    x = image_features.astype(jnp.float32)
    var = jnp.mean(x * x, axis=-1, keepdims=True)
    x = x * jax.lax.rsqrt(var + eps) * pt_params["norm_w"].astype(jnp.float32)
    d = x.shape[-1]
    pieces = []
    off = 0
    for (hp, wp) in image_sizes:
        h, w = hp // patch_size, wp // patch_size
        tok = x[off:off + h * w]
        off += h * w
        g = tok.reshape(h // s, s, w // s, s, d)      # (bi, ki, bj, kj, c)
        g = g.transpose(0, 2, 4, 1, 3)                # (bi, bj, c, ki, kj)
        pieces.append(g.reshape((h // s) * (w // s), d * s * s))
    merged = jnp.concatenate(pieces, axis=0)
    m = merged @ pt_params["wm"].T
    h_ = _gelu_exact(m @ pt_params["w1"].T + pt_params["b1"])
    return h_ @ pt_params["w2"].T + pt_params["b2"]


# ----------------------------------- main -----------------------------------
if __name__ == "__main__":
    PATCH = 16      # patch_size
    S = 2           # spatial_merge_size
    D = 64          # vision_hidden_size
    H = 256         # text_hidden_size

    key = jax.random.PRNGKey(0)
    k_feat, k_norm, k_wm, k_w1, k_b1, k_w2, k_b2 = jax.random.split(key, 7)

    # PyTorch-convention parameters (out, in), f32.
    pt_params = {
        "norm_w": 1.0 + 0.02 * jax.random.normal(k_norm, (D,), jnp.float32),
        "wm": 0.02 * jax.random.normal(k_wm, (D, D * S * S), jnp.float32),
        "w1": 0.02 * jax.random.normal(k_w1, (H, D), jnp.float32),
        "b1": 0.02 * jax.random.normal(k_b1, (H,), jnp.float32),
        "w2": 0.02 * jax.random.normal(k_w2, (H, H), jnp.float32),
        "b2": 0.02 * jax.random.normal(k_b2, (H,), jnp.float32),
    }

    def run(image_sizes, kparams, **tile_kw):
        n_tok = sum((h // PATCH) * (w // PATCH) for h, w in image_sizes)
        feats = jax.random.normal(k_feat, (n_tok, D), jnp.float32)
        out = mistral3_mm_projector(
            feats, image_sizes, kparams, patch_size=PATCH,
            spatial_merge_size=S, **tile_kw)
        out = jax.block_until_ready(out)
        ref = _reference(feats, image_sizes, pt_params, PATCH, S)
        assert out.shape == ref.shape, (out.shape, ref.shape)
        return float(jnp.max(jnp.abs(out.astype(jnp.float32) - ref)))

    # (1) f32 compute path, tiny inputs (24 tokens -> 6 merged rows): exercises
    #     the generation-aware plan's fully-resident-w2 path (single grid step)
    #     and validates the fused RMSNorm / permuted-merge / exact-GELU math.
    err_f32 = run([(64, 64), (32, 64)],
                  prepare_params(pt_params, S, compute_dtype=jnp.float32))
    assert err_f32 < 2e-3, err_f32

    # (2) bf16 compute path with explicit small tiles so the streamed-w2 path,
    #     the (row-tile, H-tile) grid and the VMEM hidden-scratch carry are
    #     exercised: 322 merged rows -> 3 row tiles (tm=112), H=256 -> 2 tiles.
    err_bf16 = run([(512, 512), (256, 256), (32, 64)],
                   prepare_params(pt_params, S, compute_dtype=jnp.bfloat16),
                   row_tile=128, col_tile=128)
    assert err_bf16 < 5e-3, err_bf16

    print("KERNEL_OK")
</pallas_src>

<mosaic_0001>
module attributes {stable_mosaic.version = 11 : i64} {
  func.func @_projector_kernel(%arg0: i32, %arg1: i32, %arg2: memref<8x256xf32, #tpu.memory_space<vmem>>, %arg3: memref<1x64xf32, #tpu.memory_space<vmem>>, %arg4: memref<256x64xf32, #tpu.memory_space<vmem>>, %arg5: memref<64x256xf32, #tpu.memory_space<vmem>>, %arg6: memref<1x256xf32, #tpu.memory_space<vmem>>, %arg7: memref<256x256xf32, #tpu.memory_space<vmem>>, %arg8: memref<1x256xf32, #tpu.memory_space<vmem>>, %arg9: memref<8x256xf32, #tpu.memory_space<vmem>>, %arg10: memref<8x256xf32, #tpu.memory_space<vmem>>, %arg11: memref<8x256xf32, #tpu.memory_space<vmem>>) attributes {dimension_semantics = [#tpu.dimension_semantics<parallel>, #tpu.dimension_semantics<arbitrary>], iteration_bounds = array<i64: 1, 1>, scalar_prefetch = 0 : i64, scratch_operands = 2 : i64, tpu.core_type = #tpu.core_type<tc>, window_params = [{transform_indices = @transform_0, window_bounds = array<i64: 8, 256>}, {pipeline_mode = #tpu.pipeline_mode<synchronous>, transform_indices = @transform_1, window_bounds = array<i64: 1, 64>}, {pipeline_mode = #tpu.pipeline_mode<synchronous>, transform_indices = @transform_2, window_bounds = array<i64: 256, 64>}, {pipeline_mode = #tpu.pipeline_mode<synchronous>, transform_indices = @transform_3, window_bounds = array<i64: 64, 256>}, {pipeline_mode = #tpu.pipeline_mode<synchronous>, transform_indices = @transform_4, window_bounds = array<i64: 1, 256>}, {pipeline_mode = #tpu.pipeline_mode<synchronous>, transform_indices = @transform_5, window_bounds = array<i64: 256, 256>}, {pipeline_mode = #tpu.pipeline_mode<synchronous>, transform_indices = @transform_6, window_bounds = array<i64: 1, 256>}, {transform_indices = @transform_7, window_bounds = array<i64: 8, 256>}]} {
    %c0_i32 = arith.constant 0 : i32
    %0 = arith.cmpi eq, %arg1, %c0_i32 : i32
    %1 = arith.extui %0 : i1 to i32
    %c0_i32_0 = arith.constant 0 : i32
    %2 = arith.cmpi ne, %1, %c0_i32_0 : i32
    scf.if %2 {
      %c0_8 = arith.constant 0 : index
      %c0_9 = arith.constant 0 : index
      %10 = vector.load %arg3[%c0_8, %c0_9] : memref<1x64xf32, #tpu.memory_space<vmem>>, vector<1x64xf32>
      %11 = vector.shape_cast %10 : vector<1x64xf32> to vector<1x64xf32>
      %12 = vector.broadcast %11 : vector<1x64xf32> to vector<8x64xf32>
      %c0_10 = arith.constant 0 : index
      %c0_11 = arith.constant 0 : index
      %13 = vector.load %arg2[%c0_10, %c0_11] : memref<8x256xf32, #tpu.memory_space<vmem>>, vector<8x64xf32>
      %14 = arith.mulf %13, %13 : vector<8x64xf32>
      %cst_12 = arith.constant dense<0.000000e+00> : vector<8xf32>
      %15 = vector.multi_reduction <add>, %14, %cst_12 [1] : vector<8x64xf32> to vector<8xf32>
      %16 = vector.shape_cast %15 : vector<8xf32> to vector<8x1xf32>
      %cst_13 = arith.constant 6.400000e+01 : f32
      %17 = vector.broadcast %cst_13 : f32 to vector<8x1xf32>
      %18 = arith.divf %16, %17 : vector<8x1xf32>
      %cst_14 = arith.constant 9.99999974E-6 : f32
      %19 = vector.broadcast %cst_14 : f32 to vector<8x1xf32>
      %20 = arith.addf %18, %19 : vector<8x1xf32>
      %21 = math.rsqrt %20 : vector<8x1xf32>
      %22 = vector.broadcast %21 : vector<8x1xf32> to vector<8x64xf32>
      %23 = arith.mulf %13, %22 : vector<8x64xf32>
      %24 = arith.mulf %23, %12 : vector<8x64xf32>
      %c0_15 = arith.constant 0 : index
      %c0_16 = arith.constant 0 : index
      %25 = vector.load %arg10[%c0_15, %c0_16] : memref<8x256xf32, #tpu.memory_space<vmem>>, vector<8x64xf32>
      tpu.vector_store %arg10[%c0_15, %c0_16], %24 {strides = array<i32>} : memref<8x256xf32, #tpu.memory_space<vmem>>, vector<8x64xf32>,
      %c0_17 = arith.constant 0 : index
      %c64 = arith.constant 64 : index
      %26 = vector.load %arg2[%c0_17, %c64] : memref<8x256xf32, #tpu.memory_space<vmem>>, vector<8x64xf32>
      %27 = arith.mulf %26, %26 : vector<8x64xf32>
      %cst_18 = arith.constant dense<0.000000e+00> : vector<8xf32>
      %28 = vector.multi_reduction <add>, %27, %cst_18 [1] : vector<8x64xf32> to vector<8xf32>
      %29 = vector.shape_cast %28 : vector<8xf32> to vector<8x1xf32>
      %cst_19 = arith.constant 6.400000e+01 : f32
      %30 = vector.broadcast %cst_19 : f32 to vector<8x1xf32>
      %31 = arith.divf %29, %30 : vector<8x1xf32>
      %cst_20 = arith.constant 9.99999974E-6 : f32
      %32 = vector.broadcast %cst_20 : f32 to vector<8x1xf32>
      %33 = arith.addf %31, %32 : vector<8x1xf32>
      %34 = math.rsqrt %33 : vector<8x1xf32>
      %35 = vector.broadcast %34 : vector<8x1xf32> to vector<8x64xf32>
      %36 = arith.mulf %26, %35 : vector<8x64xf32>
      %37 = arith.mulf %36, %12 : vector<8x64xf32>
      %c0_21 = arith.constant 0 : index
      %c64_22 = arith.constant 64 : index
      %38 = vector.load %arg10[%c0_21, %c64_22] : memref<8x256xf32, #tpu.memory_space<vmem>>, vector<8x64xf32>
      tpu.vector_store %arg10[%c0_21, %c64_22], %37 {strides = array<i32>} : memref<8x256xf32, #tpu.memory_space<vmem>>, vector<8x64xf32>,
      %c0_23 = arith.constant 0 : index
      %c128 = arith.constant 128 : index
      %39 = vector.load %arg2[%c0_23, %c128] : memref<8x256xf32, #tpu.memory_space<vmem>>, vector<8x64xf32>
      %40 = arith.mulf %39, %39 : vector<8x64xf32>
      %cst_24 = arith.constant dense<0.000000e+00> : vector<8xf32>
      %41 = vector.multi_reduction <add>, %40, %cst_24 [1] : vector<8x64xf32> to vector<8xf32>
      %42 = vector.shape_cast %41 : vector<8xf32> to vector<8x1xf32>
      %cst_25 = arith.constant 6.400000e+01 : f32
      %43 = vector.broadcast %cst_25 : f32 to vector<8x1xf32>
      %44 = arith.divf %42, %43 : vector<8x1xf32>
      %cst_26 = arith.constant 9.99999974E-6 : f32
      %45 = vector.broadcast %cst_26 : f32 to vector<8x1xf32>
      %46 = arith.addf %44, %45 : vector<8x1xf32>
      %47 = math.rsqrt %46 : vector<8x1xf32>
      %48 = vector.broadcast %47 : vector<8x1xf32> to vector<8x64xf32>
      %49 = arith.mulf %39, %48 : vector<8x64xf32>
      %50 = arith.mulf %49, %12 : vector<8x64xf32>
      %c0_27 = arith.constant 0 : index
      %c128_28 = arith.constant 128 : index
      %51 = vector.load %arg10[%c0_27, %c128_28] : memref<8x256xf32, #tpu.memory_space<vmem>>, vector<8x64xf32>
      tpu.vector_store %arg10[%c0_27, %c128_28], %50 {strides = array<i32>} : memref<8x256xf32, #tpu.memory_space<vmem>>, vector<8x64xf32>,
      %c0_29 = arith.constant 0 : index
      %c192 = arith.constant 192 : index
      %52 = vector.load %arg2[%c0_29, %c192] : memref<8x256xf32, #tpu.memory_space<vmem>>, vector<8x64xf32>
      %53 = arith.mulf %52, %52 : vector<8x64xf32>
      %cst_30 = arith.constant dense<0.000000e+00> : vector<8xf32>
      %54 = vector.multi_reduction <add>, %53, %cst_30 [1] : vector<8x64xf32> to vector<8xf32>
      %55 = vector.shape_cast %54 : vector<8xf32> to vector<8x1xf32>
      %cst_31 = arith.constant 6.400000e+01 : f32
      %56 = vector.broadcast %cst_31 : f32 to vector<8x1xf32>
      %57 = arith.divf %55, %56 : vector<8x1xf32>
      %cst_32 = arith.constant 9.99999974E-6 : f32
      %58 = vector.broadcast %cst_32 : f32 to vector<8x1xf32>
      %59 = arith.addf %57, %58 : vector<8x1xf32>
      %60 = math.rsqrt %59 : vector<8x1xf32>
      %61 = vector.broadcast %60 : vector<8x1xf32> to vector<8x64xf32>
      %62 = arith.mulf %52, %61 : vector<8x64xf32>
      %63 = arith.mulf %62, %12 : vector<8x64xf32>
      %c0_33 = arith.constant 0 : index
      %c192_34 = arith.constant 192 : index
      %64 = vector.load %arg10[%c0_33, %c192_34] : memref<8x256xf32, #tpu.memory_space<vmem>>, vector<8x64xf32>
      tpu.vector_store %arg10[%c0_33, %c192_34], %63 {strides = array<i32>} : memref<8x256xf32, #tpu.memory_space<vmem>>, vector<8x64xf32>,
      %c0_35 = arith.constant 0 : index
      %c0_36 = arith.constant 0 : index
      %65 = vector.load %arg10[%c0_35, %c0_36] : memref<8x256xf32, #tpu.memory_space<vmem>>, vector<8x256xf32>
      %c0_37 = arith.constant 0 : index
      %c0_38 = arith.constant 0 : index
      %66 = vector.load %arg4[%c0_37, %c0_38] : memref<256x64xf32, #tpu.memory_space<vmem>>, vector<256x64xf32>
      %cst_39 = arith.constant dense<0.000000e+00> : vector<8x64xf32>
      %67 = tpu.matmul %65, %66, %cst_39 {dimension_numbers = #tpu.dot_dimension_numbers<[1], [0], [0], [1], [0, 0, 1, 1], [], []>} : vector<8x256xf32>, vector<256x64xf32>, vector<8x64xf32> -> vector<8x64xf32>
      %c0_40 = arith.constant 0 : index
      %c0_41 = arith.constant 0 : index
      %68 = vector.load %arg5[%c0_40, %c0_41] : memref<64x256xf32, #tpu.memory_space<vmem>>, vector<64x256xf32>
      %cst_42 = arith.constant dense<0.000000e+00> : vector<8x256xf32>
      %69 = tpu.matmul %67, %68, %cst_42 {dimension_numbers = #tpu.dot_dimension_numbers<[1], [0], [0], [1], [0, 0, 1, 1], [], []>} : vector<8x64xf32>, vector<64x256xf32>, vector<8x256xf32> -> vector<8x256xf32>
      %c0_43 = arith.constant 0 : index
      %c0_44 = arith.constant 0 : index
      %70 = vector.load %arg6[%c0_43, %c0_44] : memref<1x256xf32, #tpu.memory_space<vmem>>, vector<1x256xf32>
      %71 = vector.broadcast %70 : vector<1x256xf32> to vector<8x256xf32>
      %72 = arith.addf %69, %71 : vector<8x256xf32>
      %cst_45 = arith.constant 5.000000e-01 : f32
      %73 = vector.broadcast %cst_45 : f32 to vector<8x256xf32>
      %74 = arith.mulf %73, %72 : vector<8x256xf32>
      %cst_46 = arith.constant 0.707106769 : f32
      %75 = vector.broadcast %cst_46 : f32 to vector<8x256xf32>
      %76 = arith.mulf %72, %75 : vector<8x256xf32>
      %77 = math.erf %76 : vector<8x256xf32>
      %cst_47 = arith.constant 1.000000e+00 : f32
      %78 = vector.broadcast %cst_47 : f32 to vector<8x256xf32>
      %79 = arith.addf %78, %77 : vector<8x256xf32>
      %80 = arith.mulf %74, %79 : vector<8x256xf32>
      %c0_48 = arith.constant 0 : index
      %c0_49 = arith.constant 0 : index
      %81 = vector.load %arg11[%c0_48, %c0_49] : memref<8x256xf32, #tpu.memory_space<vmem>>, vector<8x256xf32>
      tpu.vector_store %arg11[%c0_48, %c0_49], %80 {strides = array<i32>} : memref<8x256xf32, #tpu.memory_space<vmem>>, vector<8x256xf32>,
    } else {
    }
    %c0 = arith.constant 0 : index
    %c0_1 = arith.constant 0 : index
    %3 = vector.load %arg11[%c0, %c0_1] : memref<8x256xf32, #tpu.memory_space<vmem>>, vector<8x256xf32>
    %c0_2 = arith.constant 0 : index
    %c0_3 = arith.constant 0 : index
    %4 = vector.load %arg7[%c0_2, %c0_3] : memref<256x256xf32, #tpu.memory_space<vmem>>, vector<256x256xf32>
    %cst = arith.constant dense<0.000000e+00> : vector<8x256xf32>
    %5 = tpu.matmul %3, %4, %cst {dimension_numbers = #tpu.dot_dimension_numbers<[1], [0], [0], [1], [0, 0, 1, 1], [], []>} : vector<8x256xf32>, vector<256x256xf32>, vector<8x256xf32> -> vector<8x256xf32>
    %c0_4 = arith.constant 0 : index
    %c0_5 = arith.constant 0 : index
    %6 = vector.load %arg8[%c0_4, %c0_5] : memref<1x256xf32, #tpu.memory_space<vmem>>, vector<1x256xf32>
    %7 = vector.broadcast %6 : vector<1x256xf32> to vector<8x256xf32>
    %8 = arith.addf %5, %7 : vector<8x256xf32>
    %c0_6 = arith.constant 0 : index
    %c0_7 = arith.constant 0 : index
    %9 = vector.load %arg9[%c0_6, %c0_7] : memref<8x256xf32, #tpu.memory_space<vmem>>, vector<8x256xf32>
    tpu.vector_store %arg9[%c0_6, %c0_7], %8 {strides = array<i32>} : memref<8x256xf32, #tpu.memory_space<vmem>>, vector<8x256xf32>,
    return
  }
  func.func @transform_0(%arg0: i32, %arg1: i32) -> (i32, i32) {
    %c0_i32 = arith.constant 0 : i32
    %c0_i32_0 = arith.constant 0 : i32
    return %arg0, %c0_i32 : i32, i32
  }
  func.func @transform_1(%arg0: i32, %arg1: i32) -> (i32, i32) {
    %c0_i32 = arith.constant 0 : i32
    %c0_i32_0 = arith.constant 0 : i32
    %c0_i32_1 = arith.constant 0 : i32
    return %c0_i32, %c0_i32_0 : i32, i32
  }
  func.func @transform_2(%arg0: i32, %arg1: i32) -> (i32, i32) {
    %c0_i32 = arith.constant 0 : i32
    %c0_i32_0 = arith.constant 0 : i32
    %c0_i32_1 = arith.constant 0 : i32
    return %c0_i32, %c0_i32_0 : i32, i32
  }
  func.func @transform_3(%arg0: i32, %arg1: i32) -> (i32, i32) {
    %c0_i32 = arith.constant 0 : i32
    %c0_i32_0 = arith.constant 0 : i32
    %c0_i32_1 = arith.constant 0 : i32
    return %c0_i32, %c0_i32_0 : i32, i32
  }
  func.func @transform_4(%arg0: i32, %arg1: i32) -> (i32, i32) {
    %c0_i32 = arith.constant 0 : i32
    %c0_i32_0 = arith.constant 0 : i32
    %c0_i32_1 = arith.constant 0 : i32
    return %c0_i32, %c0_i32_0 : i32, i32
  }
  func.func @transform_5(%arg0: i32, %arg1: i32) -> (i32, i32) {
    %c0_i32 = arith.constant 0 : i32
    %c0_i32_0 = arith.constant 0 : i32
    %c0_i32_1 = arith.constant 0 : i32
    return %c0_i32, %c0_i32_0 : i32, i32
  }
  func.func @transform_6(%arg0: i32, %arg1: i32) -> (i32, i32) {
    %c0_i32 = arith.constant 0 : i32
    %c0_i32_0 = arith.constant 0 : i32
    %c0_i32_1 = arith.constant 0 : i32
    return %c0_i32, %c0_i32_0 : i32, i32
  }
  func.func @transform_7(%arg0: i32, %arg1: i32) -> (i32, i32) {
    %c0_i32 = arith.constant 0 : i32
    return %arg0, %arg1 : i32, i32
  }
}

module attributes {stable_mosaic.version = 11 : i64} {
  func.func @_projector_kernel(%arg0: i32, %arg1: i32, %arg2: memref<8x256xf32, #tpu.memory_space<vmem>>, %arg3: memref<1x64xf32, #tpu.memory_space<vmem>>, %arg4: memref<256x64xf32, #tpu.memory_space<vmem>>, %arg5: memref<64x256xf32, #tpu.memory_space<vmem>>, %arg6: memref<1x256xf32, #tpu.memory_space<vmem>>, %arg7: memref<256x256xf32, #tpu.memory_space<vmem>>, %arg8: memref<1x256xf32, #tpu.memory_space<vmem>>, %arg9: memref<8x256xf32, #tpu.memory_space<vmem>>, %arg10: memref<8x256xf32, #tpu.memory_space<vmem>>, %arg11: memref<8x256xf32, #tpu.memory_space<vmem>>) attributes {dimension_semantics = [#tpu.dimension_semantics<parallel>, #tpu.dimension_semantics<arbitrary>], iteration_bounds = array<i64: 1, 1>, scalar_prefetch = 0 : i64, scratch_operands = 2 : i64, tpu.core_type = #tpu.core_type<tc>, window_params = [{transform_indices = @transform_0, window_bounds = array<i64: 8, 256>}, {pipeline_mode = #tpu.pipeline_mode<synchronous>, transform_indices = @transform_1, window_bounds = array<i64: 1, 64>}, {pipeline_mode = #tpu.pipeline_mode<synchronous>, transform_indices = @transform_2, window_bounds = array<i64: 256, 64>}, {pipeline_mode = #tpu.pipeline_mode<synchronous>, transform_indices = @transform_3, window_bounds = array<i64: 64, 256>}, {pipeline_mode = #tpu.pipeline_mode<synchronous>, transform_indices = @transform_4, window_bounds = array<i64: 1, 256>}, {pipeline_mode = #tpu.pipeline_mode<synchronous>, transform_indices = @transform_5, window_bounds = array<i64: 256, 256>}, {pipeline_mode = #tpu.pipeline_mode<synchronous>, transform_indices = @transform_6, window_bounds = array<i64: 1, 256>}, {transform_indices = @transform_7, window_bounds = array<i64: 8, 256>}]} {
    %c0_i32 = arith.constant 0 : i32
    %0 = arith.cmpi eq, %arg1, %c0_i32 : i32
    %1 = arith.extui %0 : i1 to i32
    %c0_i32_0 = arith.constant 0 : i32
    %2 = arith.cmpi ne, %1, %c0_i32_0 : i32
    scf.if %2 {
      %c0_8 = arith.constant 0 : index
      %c0_9 = arith.constant 0 : index
      %10 = vector.load %arg3[%c0_8, %c0_9] : memref<1x64xf32, #tpu.memory_space<vmem>>, vector<1x64xf32>
      %11 = vector.shape_cast %10 : vector<1x64xf32> to vector<1x64xf32>
      %12 = vector.broadcast %11 : vector<1x64xf32> to vector<8x64xf32>
      %c0_10 = arith.constant 0 : index
      %c0_11 = arith.constant 0 : index
      %13 = vector.load %arg2[%c0_10, %c0_11] : memref<8x256xf32, #tpu.memory_space<vmem>>, vector<8x64xf32>
      %14 = arith.mulf %13, %13 : vector<8x64xf32>
      %cst_12 = arith.constant dense<0.000000e+00> : vector<8xf32>
      %15 = vector.multi_reduction <add>, %14, %cst_12 [1] : vector<8x64xf32> to vector<8xf32>
      %16 = vector.shape_cast %15 : vector<8xf32> to vector<8x1xf32>
      %cst_13 = arith.constant 6.400000e+01 : f32
      %17 = vector.broadcast %cst_13 : f32 to vector<8x1xf32>
      %18 = arith.divf %16, %17 : vector<8x1xf32>
      %cst_14 = arith.constant 9.99999974E-6 : f32
      %19 = vector.broadcast %cst_14 : f32 to vector<8x1xf32>
      %20 = arith.addf %18, %19 : vector<8x1xf32>
      %21 = math.rsqrt %20 : vector<8x1xf32>
      %22 = vector.broadcast %21 : vector<8x1xf32> to vector<8x64xf32>
      %23 = arith.mulf %13, %22 : vector<8x64xf32>
      %24 = arith.mulf %23, %12 : vector<8x64xf32>
      %c0_15 = arith.constant 0 : index
      %c0_16 = arith.constant 0 : index
      %25 = vector.load %arg10[%c0_15, %c0_16] : memref<8x256xf32, #tpu.memory_space<vmem>>, vector<8x64xf32>
      tpu.vector_store %arg10[%c0_15, %c0_16], %24 {strides = array<i32>} : memref<8x256xf32, #tpu.memory_space<vmem>>, vector<8x64xf32>,
      %c0_17 = arith.constant 0 : index
      %c64 = arith.constant 64 : index
      %26 = vector.load %arg2[%c0_17, %c64] : memref<8x256xf32, #tpu.memory_space<vmem>>, vector<8x64xf32>
      %27 = arith.mulf %26, %26 : vector<8x64xf32>
      %cst_18 = arith.constant dense<0.000000e+00> : vector<8xf32>
      %28 = vector.multi_reduction <add>, %27, %cst_18 [1] : vector<8x64xf32> to vector<8xf32>
      %29 = vector.shape_cast %28 : vector<8xf32> to vector<8x1xf32>
      %cst_19 = arith.constant 6.400000e+01 : f32
      %30 = vector.broadcast %cst_19 : f32 to vector<8x1xf32>
      %31 = arith.divf %29, %30 : vector<8x1xf32>
      %cst_20 = arith.constant 9.99999974E-6 : f32
      %32 = vector.broadcast %cst_20 : f32 to vector<8x1xf32>
      %33 = arith.addf %31, %32 : vector<8x1xf32>
      %34 = math.rsqrt %33 : vector<8x1xf32>
      %35 = vector.broadcast %34 : vector<8x1xf32> to vector<8x64xf32>
      %36 = arith.mulf %26, %35 : vector<8x64xf32>
      %37 = arith.mulf %36, %12 : vector<8x64xf32>
      %c0_21 = arith.constant 0 : index
      %c64_22 = arith.constant 64 : index
      %38 = vector.load %arg10[%c0_21, %c64_22] : memref<8x256xf32, #tpu.memory_space<vmem>>, vector<8x64xf32>
      tpu.vector_store %arg10[%c0_21, %c64_22], %37 {strides = array<i32>} : memref<8x256xf32, #tpu.memory_space<vmem>>, vector<8x64xf32>,
      %c0_23 = arith.constant 0 : index
      %c128 = arith.constant 128 : index
      %39 = vector.load %arg2[%c0_23, %c128] : memref<8x256xf32, #tpu.memory_space<vmem>>, vector<8x64xf32>
      %40 = arith.mulf %39, %39 : vector<8x64xf32>
      %cst_24 = arith.constant dense<0.000000e+00> : vector<8xf32>
      %41 = vector.multi_reduction <add>, %40, %cst_24 [1] : vector<8x64xf32> to vector<8xf32>
      %42 = vector.shape_cast %41 : vector<8xf32> to vector<8x1xf32>
      %cst_25 = arith.constant 6.400000e+01 : f32
      %43 = vector.broadcast %cst_25 : f32 to vector<8x1xf32>
      %44 = arith.divf %42, %43 : vector<8x1xf32>
      %cst_26 = arith.constant 9.99999974E-6 : f32
      %45 = vector.broadcast %cst_26 : f32 to vector<8x1xf32>
      %46 = arith.addf %44, %45 : vector<8x1xf32>
      %47 = math.rsqrt %46 : vector<8x1xf32>
      %48 = vector.broadcast %47 : vector<8x1xf32> to vector<8x64xf32>
      %49 = arith.mulf %39, %48 : vector<8x64xf32>
      %50 = arith.mulf %49, %12 : vector<8x64xf32>
      %c0_27 = arith.constant 0 : index
      %c128_28 = arith.constant 128 : index
      %51 = vector.load %arg10[%c0_27, %c128_28] : memref<8x256xf32, #tpu.memory_space<vmem>>, vector<8x64xf32>
      tpu.vector_store %arg10[%c0_27, %c128_28], %50 {strides = array<i32>} : memref<8x256xf32, #tpu.memory_space<vmem>>, vector<8x64xf32>,
      %c0_29 = arith.constant 0 : index
      %c192 = arith.constant 192 : index
      %52 = vector.load %arg2[%c0_29, %c192] : memref<8x256xf32, #tpu.memory_space<vmem>>, vector<8x64xf32>
      %53 = arith.mulf %52, %52 : vector<8x64xf32>
      %cst_30 = arith.constant dense<0.000000e+00> : vector<8xf32>
      %54 = vector.multi_reduction <add>, %53, %cst_30 [1] : vector<8x64xf32> to vector<8xf32>
      %55 = vector.shape_cast %54 : vector<8xf32> to vector<8x1xf32>
      %cst_31 = arith.constant 6.400000e+01 : f32
      %56 = vector.broadcast %cst_31 : f32 to vector<8x1xf32>
      %57 = arith.divf %55, %56 : vector<8x1xf32>
      %cst_32 = arith.constant 9.99999974E-6 : f32
      %58 = vector.broadcast %cst_32 : f32 to vector<8x1xf32>
      %59 = arith.addf %57, %58 : vector<8x1xf32>
      %60 = math.rsqrt %59 : vector<8x1xf32>
      %61 = vector.broadcast %60 : vector<8x1xf32> to vector<8x64xf32>
      %62 = arith.mulf %52, %61 : vector<8x64xf32>
      %63 = arith.mulf %62, %12 : vector<8x64xf32>
      %c0_33 = arith.constant 0 : index
      %c192_34 = arith.constant 192 : index
      %64 = vector.load %arg10[%c0_33, %c192_34] : memref<8x256xf32, #tpu.memory_space<vmem>>, vector<8x64xf32>
      tpu.vector_store %arg10[%c0_33, %c192_34], %63 {strides = array<i32>} : memref<8x256xf32, #tpu.memory_space<vmem>>, vector<8x64xf32>,
      %c0_35 = arith.constant 0 : index
      %c0_36 = arith.constant 0 : index
      %65 = vector.load %arg10[%c0_35, %c0_36] : memref<8x256xf32, #tpu.memory_space<vmem>>, vector<8x256xf32>
      %c0_37 = arith.constant 0 : index
      %c0_38 = arith.constant 0 : index
      %66 = vector.load %arg4[%c0_37, %c0_38] : memref<256x64xf32, #tpu.memory_space<vmem>>, vector<256x64xf32>
      %cst_39 = arith.constant dense<0.000000e+00> : vector<8x64xf32>
      %67 = tpu.matmul %65, %66, %cst_39 {dimension_numbers = #tpu.dot_dimension_numbers<[1], [0], [0], [1], [0, 0, 1, 1], [], []>} : vector<8x256xf32>, vector<256x64xf32>, vector<8x64xf32> -> vector<8x64xf32>
      %c0_40 = arith.constant 0 : index
      %c0_41 = arith.constant 0 : index
      %68 = vector.load %arg5[%c0_40, %c0_41] : memref<64x256xf32, #tpu.memory_space<vmem>>, vector<64x256xf32>
      %cst_42 = arith.constant dense<0.000000e+00> : vector<8x256xf32>
      %69 = tpu.matmul %67, %68, %cst_42 {dimension_numbers = #tpu.dot_dimension_numbers<[1], [0], [0], [1], [0, 0, 1, 1], [], []>} : vector<8x64xf32>, vector<64x256xf32>, vector<8x256xf32> -> vector<8x256xf32>
      %c0_43 = arith.constant 0 : index
      %c0_44 = arith.constant 0 : index
      %70 = vector.load %arg6[%c0_43, %c0_44] : memref<1x256xf32, #tpu.memory_space<vmem>>, vector<1x256xf32>
      %71 = vector.broadcast %70 : vector<1x256xf32> to vector<8x256xf32>
      %72 = arith.addf %69, %71 : vector<8x256xf32>
      %cst_45 = arith.constant 5.000000e-01 : f32
      %73 = vector.broadcast %cst_45 : f32 to vector<8x256xf32>
      %74 = arith.mulf %73, %72 : vector<8x256xf32>
      %cst_46 = arith.constant 0.707106769 : f32
      %75 = vector.broadcast %cst_46 : f32 to vector<8x256xf32>
      %76 = arith.mulf %72, %75 : vector<8x256xf32>
      %77 = math.erf %76 : vector<8x256xf32>
      %cst_47 = arith.constant 1.000000e+00 : f32
      %78 = vector.broadcast %cst_47 : f32 to vector<8x256xf32>
      %79 = arith.addf %78, %77 : vector<8x256xf32>
      %80 = arith.mulf %74, %79 : vector<8x256xf32>
      %c0_48 = arith.constant 0 : index
      %c0_49 = arith.constant 0 : index
      %81 = vector.load %arg11[%c0_48, %c0_49] : memref<8x256xf32, #tpu.memory_space<vmem>>, vector<8x256xf32>
      tpu.vector_store %arg11[%c0_48, %c0_49], %80 {strides = array<i32>} : memref<8x256xf32, #tpu.memory_space<vmem>>, vector<8x256xf32>,
    } else {
    }
    %c0 = arith.constant 0 : index
    %c0_1 = arith.constant 0 : index
    %3 = vector.load %arg11[%c0, %c0_1] : memref<8x256xf32, #tpu.memory_space<vmem>>, vector<8x256xf32>
    %c0_2 = arith.constant 0 : index
    %c0_3 = arith.constant 0 : index
    %4 = vector.load %arg7[%c0_2, %c0_3] : memref<256x256xf32, #tpu.memory_space<vmem>>, vector<256x256xf32>
    %cst = arith.constant dense<0.000000e+00> : vector<8x256xf32>
    %5 = tpu.matmul %3, %4, %cst {dimension_numbers = #tpu.dot_dimension_numbers<[1], [0], [0], [1], [0, 0, 1, 1], [], []>} : vector<8x256xf32>, vector<256x256xf32>, vector<8x256xf32> -> vector<8x256xf32>
    %c0_4 = arith.constant 0 : index
    %c0_5 = arith.constant 0 : index
    %6 = vector.load %arg8[%c0_4, %c0_5] : memref<1x256xf32, #tpu.memory_space<vmem>>, vector<1x256xf32>
    %7 = vector.broadcast %6 : vector<1x256xf32> to vector<8x256xf32>
    %8 = arith.addf %5, %7 : vector<8x256xf32>
    %c0_6 = arith.constant 0 : index
    %c0_7 = arith.constant 0 : index
    %9 = vector.load %arg9[%c0_6, %c0_7] : memref<8x256xf32, #tpu.memory_space<vmem>>, vector<8x256xf32>
    tpu.vector_store %arg9[%c0_6, %c0_7], %8 {strides = array<i32>} : memref<8x256xf32, #tpu.memory_space<vmem>>, vector<8x256xf32>,
    return
  }
  func.func @transform_0(%arg0: i32, %arg1: i32) -> (i32, i32) {
    %c0_i32 = arith.constant 0 : i32
    %c0_i32_0 = arith.constant 0 : i32
    return %arg0, %c0_i32 : i32, i32
  }
  func.func @transform_1(%arg0: i32, %arg1: i32) -> (i32, i32) {
    %c0_i32 = arith.constant 0 : i32
    %c0_i32_0 = arith.constant 0 : i32
    %c0_i32_1 = arith.constant 0 : i32
    return %c0_i32, %c0_i32_0 : i32, i32
  }
  func.func @transform_2(%arg0: i32, %arg1: i32) -> (i32, i32) {
    %c0_i32 = arith.constant 0 : i32
    %c0_i32_0 = arith.constant 0 : i32
    %c0_i32_1 = arith.constant 0 : i32
    return %c0_i32, %c0_i32_0 : i32, i32
  }
  func.func @transform_3(%arg0: i32, %arg1: i32) -> (i32, i32) {
    %c0_i32 = arith.constant 0 : i32
    %c0_i32_0 = arith.constant 0 : i32
    %c0_i32_1 = arith.constant 0 : i32
    return %c0_i32, %c0_i32_0 : i32, i32
  }
  func.func @transform_4(%arg0: i32, %arg1: i32) -> (i32, i32) {
    %c0_i32 = arith.constant 0 : i32
    %c0_i32_0 = arith.constant 0 : i32
    %c0_i32_1 = arith.constant 0 : i32
    return %c0_i32, %c0_i32_0 : i32, i32
  }
  func.func @transform_5(%arg0: i32, %arg1: i32) -> (i32, i32) {
    %c0_i32 = arith.constant 0 : i32
    %c0_i32_0 = arith.constant 0 : i32
    %c0_i32_1 = arith.constant 0 : i32
    return %c0_i32, %c0_i32_0 : i32, i32
  }
  func.func @transform_6(%arg0: i32, %arg1: i32) -> (i32, i32) {
    %c0_i32 = arith.constant 0 : i32
    %c0_i32_0 = arith.constant 0 : i32
    %c0_i32_1 = arith.constant 0 : i32
    return %c0_i32, %c0_i32_0 : i32, i32
  }
  func.func @transform_7(%arg0: i32, %arg1: i32) -> (i32, i32) {
    %c0_i32 = arith.constant 0 : i32
    return %arg0, %arg1 : i32, i32
  }
}

</mosaic_0001>

<bundles_post_ra>
// kernel: tpu_custom_call.1
= control target key start
LH: loop header
LB: loop body
LE: loop exit
PB: predicated region body
PF: predicated region fallthrough
CT: control target
= control target key end

     0   :  { %12 = vsyncpa [#allocation5], 0  ;;  %s965_s0 = inlined_call_operand.vmem [shape: f32[8,256], index: 0, kind: input, shape index: {}]   ;;  %s966_s1 = inlined_call_operand.vmem [shape: f32[1,64], index: 1, kind: input, shape index: {}]   ;;  %s967_s2 = inlined_call_operand.vmem [shape: f32[256,64], index: 2, kind: input, shape index: {}]   ;;  %s968_s3 = inlined_call_operand.vmem [shape: f32[64,256], index: 3, kind: input, shape index: {}]   ;;  %s969_s4 = inlined_call_operand.vmem [shape: f32[1,256], index: 4, kind: input, shape index: {}]   ;;  %s970_s5 = inlined_call_operand.hbm [shape: f32[256,256], index: 5, kind: input, shape index: {}]   ;;  %s971_s6 = inlined_call_operand.vmem [shape: f32[1,256], index: 6, kind: input, shape index: {}]   ;;  %s972_s7 = inlined_call_operand.hbm [shape: f32[8,256], index: 7, kind: output, shape index: {}]  }
   0x1   :  { %13 = vsyncpa [#allocation6], 0  ;;  %s709_s24 = smov [#allocation4]   ;;  %s661_s28 = scalar_lea.hbm %s970_s5, 8192 }
   0x2   :  { %s29_s25 = sshll.u32 %s709_s24, 4  ;;  %p662_p0 = scmp.ne.s32.totalorder %s970_s5, %s661_s28  ;;  %s30_s25 = int_to_ptr.vmem [resolvable:$true] %s29_s25 }
   0x3   :  { %p665_p1 = scmp.lt.u32.totalorder %s661_s28, %s970_s5 }
   0x5   :  { %p667_p2 = pnand %p665_p1, %p662_p0 }
   0x7   :  { %670 = shalt.err (!%p667_p2)
}
   0x8   :  { %s671_s10 = scalar_lea.vmem %s30_s25, 8192  ;;  %p676_p4 = scmp.lt.s32.totalorder %s30_s25, %s30_s25 }
   0x9   :  { %p672_p3 = scmp.ne.s32.totalorder %s30_s25, %s671_s10  ;;  %p677_p5 = scmp.lt.s32.totalorder %s671_s10, %s671_s10 }
   0xb   :  { %p678_p6 = por %p677_p5, %p676_p4 }
   0xd   :  { %p679_p7 = pnand %p678_p6, %p672_p3 }
   0xf   :  { %682 = shalt.err (!%p679_p7)
}
  0x10   :  { %s710_s11 = smov 256   ;;  %s711_s12 = smov 16  }
  0x11   :  { %35 = dma.hbm_to_vmem [thread:$0]  %s970_s5, 8192, %s30_s25, [#allocation5], %s710_s11, %s710_s11, %s711_s12  }
  0x12   :  { %705 = dma.done.wait [#allocation5], 8192  }
  0x13   :  { %706 = vsyncadd [#allocation5], 4294959104  ;;  %v770_v0 = vld [vmem:[%s965_s0 + $0x8] sm:$0xff]  ;;  %v775_v1 = vld [vmem:[%s965_s0] sm:$0xff]  ;;  %vm54_vm0 = vcmask 523264   ;;  %s712_s19 = smov 64  }
  0x14   :  { %v96_v2 = vmul.f32 %v770_v0, %v770_v0  ;;  %v66_v3 = vmul.f32 %v775_v1, %v775_v1  ;;  %v128_v6 = vld [vmem:[%s967_s2 + $0x80] sm:$0xff]  ;;  %v129_v7 = vld [vmem:[%s967_s2 + $0x88] sm:$0xff]  ;;  %v130_v16 = vld [vmem:[%s967_s2 + $0x90] sm:$0xff]  ;;  %vm82_vm1 = vcmask 1048064   ;;  %s714_s15 = smov [#allocation7]  }
  0x15   :  { %v531_v8 = vpack.c.bf16 %v129_v7, %v128_v6  ;;  %v112_v13 = vld [vmem:[%s967_s2] sm:$0xff]  ;;  %v113_v14 = vld [vmem:[%s967_s2 + $0x8] sm:$0xff]  ;;  %v131_v17 = vld [vmem:[%s967_s2 + $0x98] sm:$0xff]  ;;  %s485_s16 = sshll.u32 %s714_s15, 4  ;;  %s486_s16 = int_to_ptr.vmem [resolvable:$true] %s485_s16 }
  0x16   :  { %98 = vrot.lane.b32.xlu0 %v96_v2, %s712_s19  ;;  %v86_v4 = vsel %vm54_vm0, %v96_v2, 0.0  ;;  %v55_v5 = vsel %vm54_vm0, %v66_v3, 0.0  ;;  %v533_v15 = vpack.c.bf16 %v113_v14, %v112_v13  ;;  %v535_v18 = vpack.c.bf16 %v131_v17, %v130_v16  ;;  %v114_v19 = vld [vmem:[%s967_s2 + $0x10] sm:$0xff]  ;;  %v115_v20 = vld [vmem:[%s967_s2 + $0x18] sm:$0xff]  ;;  %v814_v22 = vld [vmem:[%s966_s1] ss:$0 sm:$0xff]  ;;  %p688_p9 = scmp.lt.s32.totalorder %s486_s16, %s486_s16 }
  0x17   :  { %87 = vadd.xlane.f32.xlu1 %v86_v4  ;;  %532 = vmatprep.subr.bf16.mxu0 %v531_v8  ;;  %v537_v21 = vpack.c.bf16 %v115_v20, %v114_v19  ;;  %v132_v23 = vld [vmem:[%s967_s2 + $0xa0] sm:$0xff]  ;;  %v133_v24 = vld [vmem:[%s967_s2 + $0xa8] sm:$0xff]  ;;  %v134_v29 = vld [vmem:[%s967_s2 + $0xb0] sm:$0xff]  ;;  %s683_s17 = scalar_lea.vmem %s486_s16, 256 }
  0x18   :  { %534 = vmatpush3.bf16.msra.mxu0 %v533_v15  ;;  %v539_v25 = vpack.c.bf16 %v133_v24, %v132_v23  ;;  %v116_v26 = vld [vmem:[%s967_s2 + $0x20] sm:$0xff]  ;;  %v117_v27 = vld [vmem:[%s967_s2 + $0x28] sm:$0xff]  ;;  %v135_v30 = vld [vmem:[%s967_s2 + $0xb8] sm:$0xff]  ;;  %p684_p8 = scmp.ne.s32.totalorder %s486_s16, %s683_s17  ;;  %p689_p10 = scmp.lt.s32.totalorder %s683_s17, %s683_s17 }
  0x19   :  { %536 = vmatprep.subr.bf16.mxu0 %v535_v18  ;;  %v541_v28 = vpack.c.bf16 %v117_v27, %v116_v26  ;;  %v118_v31 = vld [vmem:[%s967_s2 + $0x30] sm:$0xff]  ;;  %v543_v32 = vpack.c.bf16 %v135_v30, %v134_v29  ;;  %v119_v33 = vld [vmem:[%s967_s2 + $0x38] sm:$0xff]  ;;  %v136_v34 = vld [vmem:[%s967_s2 + $0xc0] sm:$0xff] }
  0x1a   :  { %68 = vrot.lane.b32.xlu0 %v66_v3, %s712_s19  ;;  %v137_v35 = vld [vmem:[%s967_s2 + $0xc8] sm:$0xff]  ;;  %v545_v36 = vpack.c.bf16 %v119_v33, %v118_v31  ;;  %v120_v38 = vld [vmem:[%s967_s2 + $0x40] sm:$0xff]  ;;  %v138_v45 = vld [vmem:[%s967_s2 + $0xd0] sm:$0xff]  ;;  %p690_p11 = por %p689_p10, %p688_p9 }
  0x1b   :  { %56 = vadd.xlane.f32.xlu1 %v55_v5  ;;  %v547_v37 = vpack.c.bf16 %v137_v35, %v136_v34  ;;  %v121_v39 = vld [vmem:[%s967_s2 + $0x48] sm:$0xff]  ;;  %v139_v46 = vld [vmem:[%s967_s2 + $0xd8] sm:$0xff]  ;;  %v122_v49 = vld [vmem:[%s967_s2 + $0x50] sm:$0xff] }
  0x1c   :  { %538 = vmatpush3.bf16.msra.mxu0 %v537_v21  ;;  %v549_v41 = vpack.c.bf16 %v121_v39, %v120_v38  ;;  %v551_v48 = vpack.c.bf16 %v139_v46, %v138_v45  ;;  %v123_v50 = vld [vmem:[%s967_s2 + $0x58] sm:$0xff]  ;;  %v140_v53 = vld [vmem:[%s967_s2 + $0xe0] sm:$0xff]  ;;  %v141_v54 = vld [vmem:[%s967_s2 + $0xe8] sm:$0xff]  ;;  %v713_v46 = vmov 0.0   ;;  %p691_p12 = pnand %p690_p11, %p684_p8 }
  0x1d   :  { %540 = vmatprep.subr.bf16.mxu0 %v539_v25  ;;  %v553_v51 = vpack.c.bf16 %v123_v50, %v122_v49  ;;  %v555_v55 = vpack.c.bf16 %v141_v54, %v140_v53  ;;  %v124_v56 = vld [vmem:[%s967_s2 + $0x60] sm:$0xff]  ;;  %v125_v57 = vld [vmem:[%s967_s2 + $0x68] sm:$0xff]  ;;  %v142_v59 = vld [vmem:[%s967_s2 + $0xf0] sm:$0xff] }
  0x1e   :  { %v557_v58 = vpack.c.bf16 %v125_v57, %v124_v56  ;;  %v143_v60 = vld [vmem:[%s967_s2 + $0xf8] sm:$0xff]  ;;  %v126_v62 = vld [vmem:[%s967_s2 + $0x70] sm:$0xff]  ;;  %v215_v7 = vld [vmem:[%s968_s3 + $0x8] sm:$0xff] }
  0x1f   :  { %v559_v61 = vpack.c.bf16 %v143_v60, %v142_v59  ;;  %v127_v63 = vld [vmem:[%s967_s2 + $0x78] sm:$0xff]  ;;  %v214_v25 = vld [vmem:[%s968_s3] sm:$0xff]  ;;  %v216_v26 = vld [vmem:[%s968_s3 + $0x10] sm:$0xff] }
  0x20   :  { %542 = vmatpush3.bf16.msra.mxu0 %v541_v28  ;;  %v561_v2 = vpack.c.bf16 %v127_v63, %v126_v62  ;;  %v217_v8 = vld [vmem:[%s968_s3 + $0x18] sm:$0xff]  ;;  %v565_v28 = vpack.c.bf16 %v216_v26, %v214_v25  ;;  %v218_v30 = vld [vmem:[%s968_s3 + $0x20] sm:$0xff]  ;;  %v220_v31 = vld [vmem:[%s968_s3 + $0x30] sm:$0xff] }
  0x21   :  { %544 = vmatprep.subr.bf16.mxu0 %v543_v32  ;;  %v223_v33 = vld [vmem:[%s968_s3 + $0x48] sm:$0xff]  ;;  %v225_v34 = vld [vmem:[%s968_s3 + $0x58] sm:$0xff]  ;;  %v569_v35 = vpack.c.bf16 %v220_v31, %v218_v30  ;;  %v224_v38 = vld [vmem:[%s968_s3 + $0x50] sm:$0xff] }
  0x22   :  { %v330_v49 = vld [vmem:[#allocation4] sm:$0xff]  ;;  %v337_v53 = vld [vmem:[#allocation4 + $0x38] sm:$0xff]  ;;  %v336_v57 = vld [vmem:[#allocation4 + $0x30] sm:$0xff] }
  0x23   :  { %v334_v56 = vld [vmem:[#allocation4 + $0x20] sm:$0xff]  ;;  %v341_v59 = vld [vmem:[#allocation4 + $0x58] sm:$0xff]  ;;  %v340_v63 = vld [vmem:[#allocation4 + $0x50] sm:$0xff] }
  0x24   :  { %546 = vmatpush3.bf16.msra.mxu0 %v545_v36  ;;  %v571_v36 = vpack.c.bf16 %v225_v34, %v223_v33  ;;  %v585_v60 = vpack.c.bf16 %v336_v57, %v334_v56  ;;  %v338_v62 = vld [vmem:[#allocation4 + $0x40] sm:$0xff]  ;;  %v356_v25 = vld [vmem:[#allocation4 + $0xd0] sm:$0xff]  ;;  %v359_v26 = vld [vmem:[#allocation4 + $0xe8] sm:$0xff] }
  0x25   :  { %548 = vmatprep.subr.bf16.mxu0 %v547_v37  ;;  %v222_v37 = vld [vmem:[%s968_s3 + $0x40] sm:$0xff]  ;;  %v363_v30 = vld [vmem:[#allocation4 + $0x108] sm:$0xff]  ;;  %v365_v31 = vld [vmem:[#allocation4 + $0x118] sm:$0xff] }
  0x26   :  { %v573_v39 = vpack.c.bf16 %v224_v38, %v222_v37  ;;  %v611_v33 = vpack.c.bf16 %v365_v31, %v363_v30  ;;  %v362_v34 = vld [vmem:[#allocation4 + $0x100] sm:$0xff]  ;;  %v369_v37 = vld [vmem:[#allocation4 + $0x138] sm:$0xff]  ;;  %v376_v56 = vld [vmem:[#allocation4 + $0x170] sm:$0xff] }
  0x28   :  { %550 = vmatpush3.bf16.msra.mxu0 %v549_v41  ;;  %v229_v41 = vld [vmem:[%s968_s3 + $0x78] sm:$0xff] }
  0x29   :  { %552 = vmatprep.subr.bf16.mxu0 %v551_v48  ;;  %v333_v48 = vld [vmem:[#allocation4 + $0x18] sm:$0xff] }
  0x2c   :  { %554 = vmatpush3.bf16.msra.mxu0 %v553_v51  ;;  %v332_v51 = vld [vmem:[#allocation4 + $0x10] sm:$0xff] }
  0x2d   :  { %556 = vmatprep.subr.bf16.mxu0 %v555_v55  ;;  %v581_v54 = vpack.c.bf16 %v332_v51, %v330_v49 }
  0x30   :  { %558 = vmatpush3.bf16.msra.mxu0 %v557_v58  ;;  %v339_v58 = vld [vmem:[#allocation4 + $0x48] sm:$0xff] }
  0x31   :  { %560 = vmatprep.subr.bf16.mxu0 %v559_v61  ;;  %v587_v61 = vpack.c.bf16 %v341_v59, %v339_v58  ;;  %v379_v58 = vld [vmem:[#allocation4 + $0x188] sm:$0xff]  ;;  %v381_v59 = vld [vmem:[#allocation4 + $0x198] sm:$0xff] }
  0x34   :  { %562 = vmatpush3.bf16.msra.mxu0 %v561_v2  ;;  %v343_v2 = vld [vmem:[#allocation4 + $0x68] sm:$0xff] }
  0x88   :  { %v99_v9 = vpop.permute.xlu0 %98 }
  0x89   :  { %v101_v10 = vsel %vm54_vm0, %v99_v9, 0.0 }
  0x8a   :  { %102 = vadd.xlane.f32.xlu0 %v101_v10  ;;  %v563_v10 = vpack.c.bf16 %v217_v8, %v215_v7  ;;  %v344_v7 = vld [vmem:[#allocation4 + $0x70] sm:$0xff]  ;;  %v347_v8 = vld [vmem:[#allocation4 + $0x88] sm:$0xff] }
  0x8c   :  { %v69_v11 = vpop.permute.xlu0 %68  ;;  %564 = vmatprep.subr.bf16.mxu0 %v563_v10 }
  0x8d   :  { %v71_v12 = vsel %vm54_vm0, %v69_v11, 0.0 }
  0x8e   :  { %72 = vadd.xlane.f32.xlu1 %v71_v12 }
  0x9f   :  { %78 = vrot.lane.b32.xlu1 %v814_v22, %s712_s19 }
  0xa4   :  { %v88_v40 = vpop.xlane.xlu1 %87 }
  0xa5   :  { %v89_v42 = vmul.f32 0.015625, %v88_v40  ;;  %v227_v40 = vld [vmem:[%s968_s3 + $0x68] sm:$0xff] }
  0xa7   :  { %v90_v43 = vadd.f32 1e-05, %v89_v42  ;;  %v575_v42 = vpack.c.bf16 %v229_v41, %v227_v40  ;;  %v366_v40 = vld [vmem:[#allocation4 + $0x120] sm:$0xff]  ;;  %v368_v41 = vld [vmem:[#allocation4 + $0x130] sm:$0xff] }
  0xa8   :  { %v57_v44 = vpop.xlane.xlu1 %56 }
  0xa9   :  { %649 = vrsqrt.f32 %v90_v43  ;;  %v59_v47 = vmul.f32 0.015625, %v57_v44  ;;  %v226_v43 = vld [vmem:[%s968_s3 + $0x60] sm:$0xff]  ;;  %v228_v44 = vld [vmem:[%s968_s3 + $0x70] sm:$0xff] }
  0xaa   :  { %v577_v45 = vpack.c.bf16 %v228_v44, %v226_v43  ;;  %v373_v43 = vld [vmem:[#allocation4 + $0x158] sm:$0xff]  ;;  %v617_v44 = vpack.c.bf16 %v368_v41, %v366_v40 }
  0xab   :  { %v60_v52 = vadd.f32 1e-05, %v59_v47  ;;  %v331_v47 = vld [vmem:[#allocation4 + $0x8] sm:$0xff] }
  0xac   :  { %v579_v50 = vpack.c.bf16 %v333_v48, %v331_v47  ;;  %v372_v47 = vld [vmem:[#allocation4 + $0x150] sm:$0xff] }
  0xad   :  { %651 = vrsqrt.f32 %v60_v52  ;;  %v335_v52 = vld [vmem:[#allocation4 + $0x28] sm:$0xff] }
  0xae   :  { %v583_v55 = vpack.c.bf16 %v337_v53, %v335_v52  ;;  %580 = vmatprep.subr.bf16.mxu1 %v579_v50  ;;  %v375_v52 = vld [vmem:[#allocation4 + $0x168] sm:$0xff]  ;;  %v377_v53 = vld [vmem:[#allocation4 + $0x178] sm:$0xff] }
  0xaf   :  { %582 = vmatpush1.bf16.msra.mxu1 %v581_v54  ;;  %v623_v54 = vpack.c.bf16 %v377_v53, %v375_v52 }
  0xb0   :  { %584 = vmatprep.subr.bf16.mxu1 %v583_v55  ;;  %v374_v55 = vld [vmem:[#allocation4 + $0x160] sm:$0xff] }
  0xb1   :  { %v625_v57 = vpack.c.bf16 %v376_v56, %v374_v55 }
  0xb3   :  { %v650_v3 = vpop.eup %649  ;;  %586 = vmatpush1.bf16.msra.mxu1 %v585_v60  ;;  %v627_v60 = vpack.c.bf16 %v381_v59, %v379_v58 }
  0xb4   :  { %v92_v4 = vmul.f32 %v650_v3, %v770_v0  ;;  %v345_v3 = vld [vmem:[#allocation4 + $0x78] sm:$0xff]  ;;  %588 = vmatprep.subr.bf16.mxu1 %v587_v61  ;;  %v378_v61 = vld [vmem:[#allocation4 + $0x180] sm:$0xff] }
  0xb6   :  { %v93_v5 = vmul.f32 %v814_v22, %v92_v4  ;;  %v589_v4 = vpack.c.bf16 %v340_v63, %v338_v62  ;;  %v380_v62 = vld [vmem:[#allocation4 + $0x190] sm:$0xff] }
  0xb7   :  { %v652_v6 = vpop.eup %651  ;;  %v629_v63 = vpack.c.bf16 %v380_v62, %v378_v61 }
  0xb8   :  { %94 = vst.msk [vmem:[#allocation2 + $0x8] sm:$0xff] %vm54_vm0, %v93_v5  ;;  %v62_v9 = vmul.f32 %v652_v6, %v775_v1  ;;  %v591_v5 = vpack.c.bf16 %v345_v3, %v343_v2  ;;  %v342_v6 = vld [vmem:[#allocation4 + $0x60] sm:$0xff]  ;;  %590 = vmatpush1.bf16.msra.mxu1 %v589_v4  ;;  %v383_v2 = vld [vmem:[#allocation4 + $0x1a8] sm:$0xff]  ;;  %v385_v3 = vld [vmem:[#allocation4 + $0x1b8] sm:$0xff] }
  0xb9   :  { %v593_v10 = vpack.c.bf16 %v344_v7, %v342_v6  ;;  %v631_v4 = vpack.c.bf16 %v385_v3, %v383_v2  ;;  %v384_v6 = vld [vmem:[#allocation4 + $0x1b0] sm:$0xff] }
  0xba   :  { %v63_v11 = vmul.f32 %v814_v22, %v62_v9  ;;  %v349_v9 = vld [vmem:[#allocation4 + $0x98] sm:$0xff]  ;;  %592 = vmatprep.subr.bf16.mxu1 %v591_v5  ;;  %v382_v5 = vld [vmem:[#allocation4 + $0x1a0] sm:$0xff] }
  0xbb   :  { %v633_v7 = vpack.c.bf16 %v384_v6, %v382_v5 }
  0xbc   :  { %64 = vst.msk [vmem:[#allocation2] sm:$0xff] %vm54_vm0, %v63_v11  ;;  %v595_v11 = vpack.c.bf16 %v349_v9, %v347_v8  ;;  %594 = vmatpush1.bf16.msra.mxu1 %v593_v10  ;;  %v387_v8 = vld [vmem:[#allocation4 + $0x1c8] sm:$0xff]  ;;  %v389_v9 = vld [vmem:[#allocation4 + $0x1d8] sm:$0xff] }
  0xbd   :  { %v635_v10 = vpack.c.bf16 %v389_v9, %v387_v8 }
  0xbe   :  { %596 = vmatprep.subr.bf16.mxu1 %v595_v11  ;;  %v386_v11 = vld [vmem:[#allocation4 + $0x1c0] sm:$0xff] }
 0x117   :  { %v103_v12 = vpop.xlane.xlu0 %102 }
 0x118   :  { %v104_v13 = vmul.f32 0.015625, %v103_v12  ;;  %v346_v12 = vld [vmem:[#allocation4 + $0x80] sm:$0xff] }
 0x11a   :  { %v105_v14 = vadd.f32 1e-05, %v104_v13  ;;  %v348_v13 = vld [vmem:[#allocation4 + $0x90] sm:$0xff] }
 0x11b   :  { %v73_v15 = vpop.xlane.xlu1 %72 }
 0x11c   :  { %653 = vrsqrt.f32 %v105_v14  ;;  %v74_v16 = vmul.f32 0.015625, %v73_v15  ;;  %v351_v14 = vld [vmem:[#allocation4 + $0xa8] sm:$0xff]  ;;  %v353_v15 = vld [vmem:[#allocation4 + $0xb8] sm:$0xff] }
 0x11e   :  { %v75_v17 = vadd.f32 1e-05, %v74_v16  ;;  %v597_v16 = vpack.c.bf16 %v348_v13, %v346_v12  ;;  %v388_v12 = vld [vmem:[#allocation4 + $0x1d0] sm:$0xff] }
 0x11f   :  { %v79_v19 = vpop.permute.xlu1 %78  ;;  %v637_v13 = vpack.c.bf16 %v388_v12, %v386_v11 }
 0x120   :  { %655 = vrsqrt.f32 %v75_v17  ;;  %v599_v17 = vpack.c.bf16 %v353_v15, %v351_v14  ;;  %598 = vmatpush1.bf16.msra.mxu1 %v597_v16  ;;  %v391_v14 = vld [vmem:[#allocation4 + $0x1e8] sm:$0xff]  ;;  %v393_v15 = vld [vmem:[#allocation4 + $0x1f8] sm:$0xff] }
 0x121   :  { %v639_v16 = vpack.c.bf16 %v393_v15, %v391_v14 }
 0x122   :  { %600 = vmatprep.subr.bf16.mxu1 %v599_v17  ;;  %v390_v17 = vld [vmem:[#allocation4 + $0x1e0] sm:$0xff] }
 0x126   :  { %v654_v18 = vpop.eup %653 }
 0x127   :  { %v107_v20 = vmul.f32 %v654_v18, %v770_v0  ;;  %v219_v0 = vld [vmem:[%s968_s3 + $0x28] sm:$0xff]  ;;  %v350_v18 = vld [vmem:[#allocation4 + $0xa0] sm:$0xff] }
 0x129   :  { %v108_v21 = vmul.f32 %v107_v20, %v79_v19  ;;  %v355_v20 = vld [vmem:[#allocation4 + $0xc8] sm:$0xff] }
 0x12a   :  { %v656_v23 = vpop.eup %655 }
 0x12b   :  { %v77_v22 = vmul.f32 %v656_v23, %v775_v1  ;;  %109 = vst.msk [vmem:[#allocation2 + $0x8] sm:$0xff] %vm82_vm1, %v108_v21  ;;  %v221_v1 = vld [vmem:[%s968_s3 + $0x38] sm:$0xff]  ;;  %v357_v21 = vld [vmem:[#allocation4 + $0xd8] sm:$0xff] }
 0x12c   :  { %v567_v29 = vpack.c.bf16 %v221_v1, %v219_v0 }
 0x12d   :  { %v81_v24 = vmul.f32 %v79_v19, %v77_v22  ;;  %v352_v19 = vld [vmem:[#allocation4 + $0xb0] sm:$0xff]  ;;  %v603_v22 = vpack.c.bf16 %v357_v21, %v355_v20  ;;  %v232_v20 = vlaneseq }
 0x12e   :  { %v601_v23 = vpack.c.bf16 %v352_v19, %v350_v18  ;;  %v392_v18 = vld [vmem:[#allocation4 + $0x1f0] sm:$0xff] }
 0x12f   :  { %83 = vst.msk [vmem:[#allocation2] sm:$0xff] %vm82_vm1, %v81_v24  ;;  %v354_v24 = vld [vmem:[#allocation4 + $0xc0] sm:$0xff]  ;;  %v641_v19 = vpack.c.bf16 %v392_v18, %v390_v17  ;;  %v233_v21 = vshrl.u32 %v232_v20, 7 }
 0x130   :  { %602 = vmatpush1.bf16.msra.mxu1 %v601_v23  ;;  %v605_v0 = vpack.c.bf16 %v356_v25, %v354_v24 }
 0x131   :  { %604 = vmatprep.subr.bf16.mxu1 %v603_v22  ;;  %v234_v23 = vsub.s32 0, %v233_v21  ;;  %v230_v22 = vld [vmem:[%s969_s4] sm:$0x3]  ;;  %v238_v24 = vsub.s32 1, %v233_v21 }
 0x132   :  { %v111_v27 = vld [vmem:[#allocation2 + $0x8] sm:$0xff] }
 0x133   :  { %208 = vmatprep.mubr.f32.mxu0 %v111_v27  ;;  %v361_v27 = vld [vmem:[#allocation4 + $0xf8] sm:$0xff]  ;;  %v235_v25 = vrot.slane %v230_v22, %v234_v23 }
 0x134   :  { %v607_v1 = vpack.c.bf16 %v361_v27, %v359_v26  ;;  %606 = vmatpush1.bf16.msra.mxu1 %v605_v0  ;;  %v239_v26 = vrot.slane %v230_v22, %v238_v24 }
 0x136   :  { %v110_v32 = vld [vmem:[#allocation2] sm:$0xff]  ;;  %608 = vmatprep.subr.bf16.mxu1 %v607_v1 }
 0x137   :  { %209 = vmatmul.mubr.f32.vlgmr.msra.gmra.mrb[0].mxu0 %v110_v32 }
 0x138   :  { %566 = vmatpush1.bf16.msra.mxu0 %v565_v28  ;;  %309 = vmatprep.mubr.f32.mxu0 %v713_v46  ;;  %v358_v28 = vld [vmem:[#allocation4 + $0xe0] sm:$0xff] }
 0x139   :  { %568 = vmatprep.subr.bf16.mxu0 %v567_v29  ;;  %v360_v29 = vld [vmem:[#allocation4 + $0xf0] sm:$0xff]  ;;  %v370_v46 = vld [vmem:[#allocation4 + $0x140] sm:$0xff] }
 0x13a   :  { %v609_v32 = vpack.c.bf16 %v360_v29, %v358_v28  ;;  %v621_v48 = vpack.c.bf16 %v372_v47, %v370_v46 }
 0x13c   :  { %570 = vmatpush1.bf16.msra.mxu0 %v569_v35  ;;  %v364_v35 = vld [vmem:[#allocation4 + $0x110] sm:$0xff]  ;;  %610 = vmatpush1.bf16.msra.mxu1 %v609_v32 }
 0x13d   :  { %572 = vmatprep.subr.bf16.mxu0 %v571_v36  ;;  %v367_v36 = vld [vmem:[#allocation4 + $0x128] sm:$0xff]  ;;  %v613_v38 = vpack.c.bf16 %v364_v35, %v362_v34  ;;  %612 = vmatprep.subr.bf16.mxu1 %v611_v33 }
 0x140   :  { %574 = vmatpush1.bf16.msra.mxu0 %v573_v39  ;;  %v615_v39 = vpack.c.bf16 %v369_v37, %v367_v36  ;;  %614 = vmatpush1.bf16.msra.mxu1 %v613_v38 }
 0x141   :  { %576 = vmatprep.subr.bf16.mxu0 %v575_v42  ;;  %v371_v42 = vld [vmem:[#allocation4 + $0x148] sm:$0xff] }
 0x142   :  { %616 = vmatprep.subr.bf16.mxu1 %v615_v39  ;;  %v394_v39 = vld [vmem:[%s971_s6] sm:$0x3] }
 0x143   :  { %v399_v40 = vrot.slane %v394_v39, %v234_v23  ;;  %v403_v41 = vrot.slane %v394_v39, %v238_v24 }
 0x144   :  { %578 = vmatpush1.bf16.msra.mxu0 %v577_v45  ;;  %v619_v45 = vpack.c.bf16 %v373_v43, %v371_v42  ;;  %618 = vmatpush1.bf16.msra.mxu1 %v617_v44 }
 0x146   :  { %620 = vmatprep.subr.bf16.mxu1 %v619_v45 }
 0x148   :  { %622 = vmatpush1.bf16.msra.mxu1 %v621_v48 }
 0x149   :  { %624 = vmatprep.subr.bf16.mxu1 %v623_v54 }
 0x14c   :  { %626 = vmatpush1.bf16.msra.mxu1 %v625_v57 }
 0x14d   :  { %628 = vmatprep.subr.bf16.mxu1 %v627_v60 }
 0x150   :  { %630 = vmatpush1.bf16.msra.mxu1 %v629_v63 }
 0x151   :  { %632 = vmatprep.subr.bf16.mxu1 %v631_v4 }
 0x154   :  { %634 = vmatpush1.bf16.msra.mxu1 %v633_v7 }
 0x155   :  { %636 = vmatprep.subr.bf16.mxu1 %v635_v10 }
 0x158   :  { %638 = vmatpush1.bf16.msra.mxu1 %v637_v13 }
 0x159   :  { %640 = vmatprep.subr.bf16.mxu1 %v639_v16 }
 0x15c   :  { %642 = vmatpush1.bf16.msra.mxu1 %v641_v19 }
 0x20a   :  { %v528_v49 = vpop.f32.mrb[0].mxu0 }
 0x20b   :  { %v529_v50 = vpop.f32.mrb[1].mxu0 }
 0x20c   :  { %v530_v51 = vadd.f32 %v529_v50, %v528_v49 }
 0x20e   :  { %495 = vmatmul.mubr.msk.f32.vlgmr.msra.gmra.mrb[2].mxu0 %vm54_vm0, %v530_v51 }
 0x2e1   :  { %v311_v27 = vpop.f32.mrb[2].mxu0 }
 0x2e2   :  { %v312_v0 = vadd.f32 %v311_v27, %v235_v25  ;;  %v313_v1 = vpop.f32.mrb[3].mxu0 }
 0x2e3   :  { %v314_v28 = vadd.f32 %v313_v1, %v239_v26 }
 0x2e4   :  { %v318_v29 = vmul.f32 0.70710677, %v312_v0  ;;  %v316_v36 = vmul.f32 0.5, %v312_v0 }
 0x2e5   :  { %v319_v30 = vmul.f32 0.70710677, %v314_v28  ;;  %v317_v34 = vmul.f32 0.5, %v314_v28 }
 0x2e6   :  { %657 = verf.f32 %v318_v29 }
 0x2e7   :  { %659 = verf.f32 %v319_v30 }
 0x2f0   :  { %v658_v31 = vpop.eup %657 }
 0x2f1   :  { %v660_v32 = vpop.eup %659  ;;  %v322_v33 = vadd.f32 1.0, %v658_v31 }
 0x2f2   :  { %v323_v35 = vadd.f32 1.0, %v660_v32 }
 0x2f3   :  { %v324_v38 = vmul.f32 %v322_v33, %v316_v36 }
 0x2f4   :  { %v325_v37 = vmul.f32 %v323_v35, %v317_v34 }
 0x2f6   :  { %470 = vmatprep.mubr.f32.mxu1 %v325_v37 }
 0x2f7   :  { %471 = vmatmul.mubr.f32.vlgmr.msra.gmra.mrb[0].mxu1 %v324_v38 }
 0x3ca   :  { %v472_v42 = vpop.f32.mrb[0].mxu1 }
 0x3cb   :  { %v473_v43 = vadd.f32 %v472_v42, %v399_v40  ;;  %v474_v44 = vpop.f32.mrb[1].mxu1 }
 0x3cc   :  { %v475_v45 = vadd.f32 %v474_v44, %v403_v41 }
 0x3cd   :  { %477 = vst [vmem:[#allocation7] sm:$0xff] %v473_v43 }
 0x3ce   :  { %478 = vst [vmem:[#allocation7 + $0x8] sm:$0xff] %v475_v45 }
 0x3cf   :  { %694 = shalt.err (!%p691_p12)
}
 0x3d0   :  { %s695_s0 = scalar_lea.hbm %s972_s7, 256 }
 0x3d1   :  { %p696_p13 = scmp.ne.s32.totalorder %s972_s7, %s695_s0  ;;  %p699_p0 = scmp.lt.u32.totalorder %s695_s0, %s972_s7 }
 0x3d3   :  { %p701_p1 = pnand %p699_p0, %p696_p13 }
 0x3d5   :  { %704 = shalt.err (!%p701_p1)
}
 0x3d6   :  { %488 = dma.vmem_to_hbm [thread:$0]  %s486_s16, 256, %s972_s7, [#allocation6]  }
 0x3d7   :  { %707 = dma.done.wait [#allocation6], 256  }
 0x3d8   :  { %708 = vsyncadd [#allocation6], 4294967040 }
 0x3d9   :  { %492 = vsyncpa [#allocation5], 1 }
 0x3da   :  { %493 = vsyncpa [#allocation6], 1 }

// kernel: tpu_custom_call.1
= control target key start
LH: loop header
LB: loop body
LE: loop exit
PB: predicated region body
PF: predicated region fallthrough
CT: control target
= control target key end

     0   :  { %12 = vsyncpa [#allocation5], 0  ;;  %s965_s0 = inlined_call_operand.vmem [shape: f32[8,256], index: 0, kind: input, shape index: {}]   ;;  %s966_s1 = inlined_call_operand.vmem [shape: f32[1,64], index: 1, kind: input, shape index: {}]   ;;  %s967_s2 = inlined_call_operand.vmem [shape: f32[256,64], index: 2, kind: input, shape index: {}]   ;;  %s968_s3 = inlined_call_operand.vmem [shape: f32[64,256], index: 3, kind: input, shape index: {}]   ;;  %s969_s4 = inlined_call_operand.vmem [shape: f32[1,256], index: 4, kind: input, shape index: {}]   ;;  %s970_s5 = inlined_call_operand.hbm [shape: f32[256,256], index: 5, kind: input, shape index: {}]   ;;  %s971_s6 = inlined_call_operand.vmem [shape: f32[1,256], index: 6, kind: input, shape index: {}]   ;;  %s972_s7 = inlined_call_operand.hbm [shape: f32[8,256], index: 7, kind: output, shape index: {}]  }
   0x1   :  { %13 = vsyncpa [#allocation6], 0  ;;  %s709_s24 = smov [#allocation4]   ;;  %s661_s28 = scalar_lea.hbm %s970_s5, 8192 }
   0x2   :  { %s29_s25 = sshll.u32 %s709_s24, 4  ;;  %p662_p0 = scmp.ne.s32.totalorder %s970_s5, %s661_s28  ;;  %s30_s25 = int_to_ptr.vmem [resolvable:$true] %s29_s25 }
   0x3   :  { %p665_p1 = scmp.lt.u32.totalorder %s661_s28, %s970_s5 }
   0x5   :  { %p667_p2 = pnand %p665_p1, %p662_p0 }
   0x7   :  { %670 = shalt.err (!%p667_p2)
}
   0x8   :  { %s671_s10 = scalar_lea.vmem %s30_s25, 8192  ;;  %p676_p4 = scmp.lt.s32.totalorder %s30_s25, %s30_s25 }
   0x9   :  { %p672_p3 = scmp.ne.s32.totalorder %s30_s25, %s671_s10  ;;  %p677_p5 = scmp.lt.s32.totalorder %s671_s10, %s671_s10 }
   0xb   :  { %p678_p6 = por %p677_p5, %p676_p4 }
   0xd   :  { %p679_p7 = pnand %p678_p6, %p672_p3 }
   0xf   :  { %682 = shalt.err (!%p679_p7)
}
  0x10   :  { %s710_s11 = smov 256   ;;  %s711_s12 = smov 16  }
  0x11   :  { %35 = dma.hbm_to_vmem [thread:$0]  %s970_s5, 8192, %s30_s25, [#allocation5], %s710_s11, %s710_s11, %s711_s12  }
  0x12   :  { %705 = dma.done.wait [#allocation5], 8192  }
  0x13   :  { %706 = vsyncadd [#allocation5], 4294959104  ;;  %v770_v0 = vld [vmem:[%s965_s0 + $0x8] sm:$0xff]  ;;  %v775_v1 = vld [vmem:[%s965_s0] sm:$0xff]  ;;  %vm54_vm0 = vcmask 523264   ;;  %s712_s19 = smov 64  }
  0x14   :  { %v96_v2 = vmul.f32 %v770_v0, %v770_v0  ;;  %v66_v3 = vmul.f32 %v775_v1, %v775_v1  ;;  %v128_v6 = vld [vmem:[%s967_s2 + $0x80] sm:$0xff]  ;;  %v129_v7 = vld [vmem:[%s967_s2 + $0x88] sm:$0xff]  ;;  %v130_v16 = vld [vmem:[%s967_s2 + $0x90] sm:$0xff]  ;;  %vm82_vm1 = vcmask 1048064   ;;  %s714_s15 = smov [#allocation7]  }
  0x15   :  { %v531_v8 = vpack.c.bf16 %v129_v7, %v128_v6  ;;  %v112_v13 = vld [vmem:[%s967_s2] sm:$0xff]  ;;  %v113_v14 = vld [vmem:[%s967_s2 + $0x8] sm:$0xff]  ;;  %v131_v17 = vld [vmem:[%s967_s2 + $0x98] sm:$0xff]  ;;  %s485_s16 = sshll.u32 %s714_s15, 4  ;;  %s486_s16 = int_to_ptr.vmem [resolvable:$true] %s485_s16 }
  0x16   :  { %98 = vrot.lane.b32.xlu0 %v96_v2, %s712_s19  ;;  %v86_v4 = vsel %vm54_vm0, %v96_v2, 0.0  ;;  %v55_v5 = vsel %vm54_vm0, %v66_v3, 0.0  ;;  %v533_v15 = vpack.c.bf16 %v113_v14, %v112_v13  ;;  %v535_v18 = vpack.c.bf16 %v131_v17, %v130_v16  ;;  %v114_v19 = vld [vmem:[%s967_s2 + $0x10] sm:$0xff]  ;;  %v115_v20 = vld [vmem:[%s967_s2 + $0x18] sm:$0xff]  ;;  %v814_v22 = vld [vmem:[%s966_s1] ss:$0 sm:$0xff]  ;;  %p688_p9 = scmp.lt.s32.totalorder %s486_s16, %s486_s16 }
  0x17   :  { %87 = vadd.xlane.f32.xlu1 %v86_v4  ;;  %532 = vmatprep.subr.bf16.mxu0 %v531_v8  ;;  %v537_v21 = vpack.c.bf16 %v115_v20, %v114_v19  ;;  %v132_v23 = vld [vmem:[%s967_s2 + $0xa0] sm:$0xff]  ;;  %v133_v24 = vld [vmem:[%s967_s2 + $0xa8] sm:$0xff]  ;;  %v134_v29 = vld [vmem:[%s967_s2 + $0xb0] sm:$0xff]  ;;  %s683_s17 = scalar_lea.vmem %s486_s16, 256 }
  0x18   :  { %534 = vmatpush3.bf16.msra.mxu0 %v533_v15  ;;  %v539_v25 = vpack.c.bf16 %v133_v24, %v132_v23  ;;  %v116_v26 = vld [vmem:[%s967_s2 + $0x20] sm:$0xff]  ;;  %v117_v27 = vld [vmem:[%s967_s2 + $0x28] sm:$0xff]  ;;  %v135_v30 = vld [vmem:[%s967_s2 + $0xb8] sm:$0xff]  ;;  %p684_p8 = scmp.ne.s32.totalorder %s486_s16, %s683_s17  ;;  %p689_p10 = scmp.lt.s32.totalorder %s683_s17, %s683_s17 }
  0x19   :  { %536 = vmatprep.subr.bf16.mxu0 %v535_v18  ;;  %v541_v28 = vpack.c.bf16 %v117_v27, %v116_v26  ;;  %v118_v31 = vld [vmem:[%s967_s2 + $0x30] sm:$0xff]  ;;  %v543_v32 = vpack.c.bf16 %v135_v30, %v134_v29  ;;  %v119_v33 = vld [vmem:[%s967_s2 + $0x38] sm:$0xff]  ;;  %v136_v34 = vld [vmem:[%s967_s2 + $0xc0] sm:$0xff] }
  0x1a   :  { %68 = vrot.lane.b32.xlu0 %v66_v3, %s712_s19  ;;  %v137_v35 = vld [vmem:[%s967_s2 + $0xc8] sm:$0xff]  ;;  %v545_v36 = vpack.c.bf16 %v119_v33, %v118_v31  ;;  %v120_v38 = vld [vmem:[%s967_s2 + $0x40] sm:$0xff]  ;;  %v138_v45 = vld [vmem:[%s967_s2 + $0xd0] sm:$0xff]  ;;  %p690_p11 = por %p689_p10, %p688_p9 }
  0x1b   :  { %56 = vadd.xlane.f32.xlu1 %v55_v5  ;;  %v547_v37 = vpack.c.bf16 %v137_v35, %v136_v34  ;;  %v121_v39 = vld [vmem:[%s967_s2 + $0x48] sm:$0xff]  ;;  %v139_v46 = vld [vmem:[%s967_s2 + $0xd8] sm:$0xff]  ;;  %v122_v49 = vld [vmem:[%s967_s2 + $0x50] sm:$0xff] }
  0x1c   :  { %538 = vmatpush3.bf16.msra.mxu0 %v537_v21  ;;  %v549_v41 = vpack.c.bf16 %v121_v39, %v120_v38  ;;  %v551_v48 = vpack.c.bf16 %v139_v46, %v138_v45  ;;  %v123_v50 = vld [vmem:[%s967_s2 + $0x58] sm:$0xff]  ;;  %v140_v53 = vld [vmem:[%s967_s2 + $0xe0] sm:$0xff]  ;;  %v141_v54 = vld [vmem:[%s967_s2 + $0xe8] sm:$0xff]  ;;  %v713_v46 = vmov 0.0   ;;  %p691_p12 = pnand %p690_p11, %p684_p8 }
  0x1d   :  { %540 = vmatprep.subr.bf16.mxu0 %v539_v25  ;;  %v553_v51 = vpack.c.bf16 %v123_v50, %v122_v49  ;;  %v555_v55 = vpack.c.bf16 %v141_v54, %v140_v53  ;;  %v124_v56 = vld [vmem:[%s967_s2 + $0x60] sm:$0xff]  ;;  %v125_v57 = vld [vmem:[%s967_s2 + $0x68] sm:$0xff]  ;;  %v142_v59 = vld [vmem:[%s967_s2 + $0xf0] sm:$0xff] }
  0x1e   :  { %v557_v58 = vpack.c.bf16 %v125_v57, %v124_v56  ;;  %v143_v60 = vld [vmem:[%s967_s2 + $0xf8] sm:$0xff]  ;;  %v126_v62 = vld [vmem:[%s967_s2 + $0x70] sm:$0xff]  ;;  %v215_v7 = vld [vmem:[%s968_s3 + $0x8] sm:$0xff] }
  0x1f   :  { %v559_v61 = vpack.c.bf16 %v143_v60, %v142_v59  ;;  %v127_v63 = vld [vmem:[%s967_s2 + $0x78] sm:$0xff]  ;;  %v214_v25 = vld [vmem:[%s968_s3] sm:$0xff]  ;;  %v216_v26 = vld [vmem:[%s968_s3 + $0x10] sm:$0xff] }
  0x20   :  { %542 = vmatpush3.bf16.msra.mxu0 %v541_v28  ;;  %v561_v2 = vpack.c.bf16 %v127_v63, %v126_v62  ;;  %v217_v8 = vld [vmem:[%s968_s3 + $0x18] sm:$0xff]  ;;  %v565_v28 = vpack.c.bf16 %v216_v26, %v214_v25  ;;  %v218_v30 = vld [vmem:[%s968_s3 + $0x20] sm:$0xff]  ;;  %v220_v31 = vld [vmem:[%s968_s3 + $0x30] sm:$0xff] }
  0x21   :  { %544 = vmatprep.subr.bf16.mxu0 %v543_v32  ;;  %v223_v33 = vld [vmem:[%s968_s3 + $0x48] sm:$0xff]  ;;  %v225_v34 = vld [vmem:[%s968_s3 + $0x58] sm:$0xff]  ;;  %v569_v35 = vpack.c.bf16 %v220_v31, %v218_v30  ;;  %v224_v38 = vld [vmem:[%s968_s3 + $0x50] sm:$0xff] }
  0x22   :  { %v330_v49 = vld [vmem:[#allocation4] sm:$0xff]  ;;  %v337_v53 = vld [vmem:[#allocation4 + $0x38] sm:$0xff]  ;;  %v336_v57 = vld [vmem:[#allocation4 + $0x30] sm:$0xff] }
  0x23   :  { %v334_v56 = vld [vmem:[#allocation4 + $0x20] sm:$0xff]  ;;  %v341_v59 = vld [vmem:[#allocation4 + $0x58] sm:$0xff]  ;;  %v340_v63 = vld [vmem:[#allocation4 + $0x50] sm:$0xff] }
  0x24   :  { %546 = vmatpush3.bf16.msra.mxu0 %v545_v36  ;;  %v571_v36 = vpack.c.bf16 %v225_v34, %v223_v33  ;;  %v585_v60 = vpack.c.bf16 %v336_v57, %v334_v56  ;;  %v338_v62 = vld [vmem:[#allocation4 + $0x40] sm:$0xff]  ;;  %v356_v25 = vld [vmem:[#allocation4 + $0xd0] sm:$0xff]  ;;  %v359_v26 = vld [vmem:[#allocation4 + $0xe8] sm:$0xff] }
  0x25   :  { %548 = vmatprep.subr.bf16.mxu0 %v547_v37  ;;  %v222_v37 = vld [vmem:[%s968_s3 + $0x40] sm:$0xff]  ;;  %v363_v30 = vld [vmem:[#allocation4 + $0x108] sm:$0xff]  ;;  %v365_v31 = vld [vmem:[#allocation4 + $0x118] sm:$0xff] }
  0x26   :  { %v573_v39 = vpack.c.bf16 %v224_v38, %v222_v37  ;;  %v611_v33 = vpack.c.bf16 %v365_v31, %v363_v30  ;;  %v362_v34 = vld [vmem:[#allocation4 + $0x100] sm:$0xff]  ;;  %v369_v37 = vld [vmem:[#allocation4 + $0x138] sm:$0xff]  ;;  %v376_v56 = vld [vmem:[#allocation4 + $0x170] sm:$0xff] }
  0x28   :  { %550 = vmatpush3.bf16.msra.mxu0 %v549_v41  ;;  %v229_v41 = vld [vmem:[%s968_s3 + $0x78] sm:$0xff] }
  0x29   :  { %552 = vmatprep.subr.bf16.mxu0 %v551_v48  ;;  %v333_v48 = vld [vmem:[#allocation4 + $0x18] sm:$0xff] }
  0x2c   :  { %554 = vmatpush3.bf16.msra.mxu0 %v553_v51  ;;  %v332_v51 = vld [vmem:[#allocation4 + $0x10] sm:$0xff] }
  0x2d   :  { %556 = vmatprep.subr.bf16.mxu0 %v555_v55  ;;  %v581_v54 = vpack.c.bf16 %v332_v51, %v330_v49 }
  0x30   :  { %558 = vmatpush3.bf16.msra.mxu0 %v557_v58  ;;  %v339_v58 = vld [vmem:[#allocation4 + $0x48] sm:$0xff] }
  0x31   :  { %560 = vmatprep.subr.bf16.mxu0 %v559_v61  ;;  %v587_v61 = vpack.c.bf16 %v341_v59, %v339_v58  ;;  %v379_v58 = vld [vmem:[#allocation4 + $0x188] sm:$0xff]  ;;  %v381_v59 = vld [vmem:[#allocation4 + $0x198] sm:$0xff] }
  0x34   :  { %562 = vmatpush3.bf16.msra.mxu0 %v561_v2  ;;  %v343_v2 = vld [vmem:[#allocation4 + $0x68] sm:$0xff] }
  0x88   :  { %v99_v9 = vpop.permute.xlu0 %98 }
  0x89   :  { %v101_v10 = vsel %vm54_vm0, %v99_v9, 0.0 }
  0x8a   :  { %102 = vadd.xlane.f32.xlu0 %v101_v10  ;;  %v563_v10 = vpack.c.bf16 %v217_v8, %v215_v7  ;;  %v344_v7 = vld [vmem:[#allocation4 + $0x70] sm:$0xff]  ;;  %v347_v8 = vld [vmem:[#allocation4 + $0x88] sm:$0xff] }
  0x8c   :  { %v69_v11 = vpop.permute.xlu0 %68  ;;  %564 = vmatprep.subr.bf16.mxu0 %v563_v10 }
  0x8d   :  { %v71_v12 = vsel %vm54_vm0, %v69_v11, 0.0 }
  0x8e   :  { %72 = vadd.xlane.f32.xlu1 %v71_v12 }
  0x9f   :  { %78 = vrot.lane.b32.xlu1 %v814_v22, %s712_s19 }
  0xa4   :  { %v88_v40 = vpop.xlane.xlu1 %87 }
  0xa5   :  { %v89_v42 = vmul.f32 0.015625, %v88_v40  ;;  %v227_v40 = vld [vmem:[%s968_s3 + $0x68] sm:$0xff] }
  0xa7   :  { %v90_v43 = vadd.f32 1e-05, %v89_v42  ;;  %v575_v42 = vpack.c.bf16 %v229_v41, %v227_v40  ;;  %v366_v40 = vld [vmem:[#allocation4 + $0x120] sm:$0xff]  ;;  %v368_v41 = vld [vmem:[#allocation4 + $0x130] sm:$0xff] }
  0xa8   :  { %v57_v44 = vpop.xlane.xlu1 %56 }
  0xa9   :  { %649 = vrsqrt.f32 %v90_v43  ;;  %v59_v47 = vmul.f32 0.015625, %v57_v44  ;;  %v226_v43 = vld [vmem:[%s968_s3 + $0x60] sm:$0xff]  ;;  %v228_v44 = vld [vmem:[%s968_s3 + $0x70] sm:$0xff] }
  0xaa   :  { %v577_v45 = vpack.c.bf16 %v228_v44, %v226_v43  ;;  %v373_v43 = vld [vmem:[#allocation4 + $0x158] sm:$0xff]  ;;  %v617_v44 = vpack.c.bf16 %v368_v41, %v366_v40 }
  0xab   :  { %v60_v52 = vadd.f32 1e-05, %v59_v47  ;;  %v331_v47 = vld [vmem:[#allocation4 + $0x8] sm:$0xff] }
  0xac   :  { %v579_v50 = vpack.c.bf16 %v333_v48, %v331_v47  ;;  %v372_v47 = vld [vmem:[#allocation4 + $0x150] sm:$0xff] }
  0xad   :  { %651 = vrsqrt.f32 %v60_v52  ;;  %v335_v52 = vld [vmem:[#allocation4 + $0x28] sm:$0xff] }
  0xae   :  { %v583_v55 = vpack.c.bf16 %v337_v53, %v335_v52  ;;  %580 = vmatprep.subr.bf16.mxu1 %v579_v50  ;;  %v375_v52 = vld [vmem:[#allocation4 + $0x168] sm:$0xff]  ;;  %v377_v53 = vld [vmem:[#allocation4 + $0x178] sm:$0xff] }
  0xaf   :  { %582 = vmatpush1.bf16.msra.mxu1 %v581_v54  ;;  %v623_v54 = vpack.c.bf16 %v377_v53, %v375_v52 }
  0xb0   :  { %584 = vmatprep.subr.bf16.mxu1 %v583_v55  ;;  %v374_v55 = vld [vmem:[#allocation4 + $0x160] sm:$0xff] }
  0xb1   :  { %v625_v57 = vpack.c.bf16 %v376_v56, %v374_v55 }
  0xb3   :  { %v650_v3 = vpop.eup %649  ;;  %586 = vmatpush1.bf16.msra.mxu1 %v585_v60  ;;  %v627_v60 = vpack.c.bf16 %v381_v59, %v379_v58 }
  0xb4   :  { %v92_v4 = vmul.f32 %v650_v3, %v770_v0  ;;  %v345_v3 = vld [vmem:[#allocation4 + $0x78] sm:$0xff]  ;;  %588 = vmatprep.subr.bf16.mxu1 %v587_v61  ;;  %v378_v61 = vld [vmem:[#allocation4 + $0x180] sm:$0xff] }
  0xb6   :  { %v93_v5 = vmul.f32 %v814_v22, %v92_v4  ;;  %v589_v4 = vpack.c.bf16 %v340_v63, %v338_v62  ;;  %v380_v62 = vld [vmem:[#allocation4 + $0x190] sm:$0xff] }
  0xb7   :  { %v652_v6 = vpop.eup %651  ;;  %v629_v63 = vpack.c.bf16 %v380_v62, %v378_v61 }
  0xb8   :  { %94 = vst.msk [vmem:[#allocation2 + $0x8] sm:$0xff] %vm54_vm0, %v93_v5  ;;  %v62_v9 = vmul.f32 %v652_v6, %v775_v1  ;;  %v591_v5 = vpack.c.bf16 %v345_v3, %v343_v2  ;;  %v342_v6 = vld [vmem:[#allocation4 + $0x60] sm:$0xff]  ;;  %590 = vmatpush1.bf16.msra.mxu1 %v589_v4  ;;  %v383_v2 = vld [vmem:[#allocation4 + $0x1a8] sm:$0xff]  ;;  %v385_v3 = vld [vmem:[#allocation4 + $0x1b8] sm:$0xff] }
  0xb9   :  { %v593_v10 = vpack.c.bf16 %v344_v7, %v342_v6  ;;  %v631_v4 = vpack.c.bf16 %v385_v3, %v383_v2  ;;  %v384_v6 = vld [vmem:[#allocation4 + $0x1b0] sm:$0xff] }
  0xba   :  { %v63_v11 = vmul.f32 %v814_v22, %v62_v9  ;;  %v349_v9 = vld [vmem:[#allocation4 + $0x98] sm:$0xff]  ;;  %592 = vmatprep.subr.bf16.mxu1 %v591_v5  ;;  %v382_v5 = vld [vmem:[#allocation4 + $0x1a0] sm:$0xff] }
  0xbb   :  { %v633_v7 = vpack.c.bf16 %v384_v6, %v382_v5 }
  0xbc   :  { %64 = vst.msk [vmem:[#allocation2] sm:$0xff] %vm54_vm0, %v63_v11  ;;  %v595_v11 = vpack.c.bf16 %v349_v9, %v347_v8  ;;  %594 = vmatpush1.bf16.msra.mxu1 %v593_v10  ;;  %v387_v8 = vld [vmem:[#allocation4 + $0x1c8] sm:$0xff]  ;;  %v389_v9 = vld [vmem:[#allocation4 + $0x1d8] sm:$0xff] }
  0xbd   :  { %v635_v10 = vpack.c.bf16 %v389_v9, %v387_v8 }
  0xbe   :  { %596 = vmatprep.subr.bf16.mxu1 %v595_v11  ;;  %v386_v11 = vld [vmem:[#allocation4 + $0x1c0] sm:$0xff] }
 0x117   :  { %v103_v12 = vpop.xlane.xlu0 %102 }
 0x118   :  { %v104_v13 = vmul.f32 0.015625, %v103_v12  ;;  %v346_v12 = vld [vmem:[#allocation4 + $0x80] sm:$0xff] }
 0x11a   :  { %v105_v14 = vadd.f32 1e-05, %v104_v13  ;;  %v348_v13 = vld [vmem:[#allocation4 + $0x90] sm:$0xff] }
 0x11b   :  { %v73_v15 = vpop.xlane.xlu1 %72 }
 0x11c   :  { %653 = vrsqrt.f32 %v105_v14  ;;  %v74_v16 = vmul.f32 0.015625, %v73_v15  ;;  %v351_v14 = vld [vmem:[#allocation4 + $0xa8] sm:$0xff]  ;;  %v353_v15 = vld [vmem:[#allocation4 + $0xb8] sm:$0xff] }
 0x11e   :  { %v75_v17 = vadd.f32 1e-05, %v74_v16  ;;  %v597_v16 = vpack.c.bf16 %v348_v13, %v346_v12  ;;  %v388_v12 = vld [vmem:[#allocation4 + $0x1d0] sm:$0xff] }
 0x11f   :  { %v79_v19 = vpop.permute.xlu1 %78  ;;  %v637_v13 = vpack.c.bf16 %v388_v12, %v386_v11 }
 0x120   :  { %655 = vrsqrt.f32 %v75_v17  ;;  %v599_v17 = vpack.c.bf16 %v353_v15, %v351_v14  ;;  %598 = vmatpush1.bf16.msra.mxu1 %v597_v16  ;;  %v391_v14 = vld [vmem:[#allocation4 + $0x1e8] sm:$0xff]  ;;  %v393_v15 = vld [vmem:[#allocation4 + $0x1f8] sm:$0xff] }
 0x121   :  { %v639_v16 = vpack.c.bf16 %v393_v15, %v391_v14 }
 0x122   :  { %600 = vmatprep.subr.bf16.mxu1 %v599_v17  ;;  %v390_v17 = vld [vmem:[#allocation4 + $0x1e0] sm:$0xff] }
 0x126   :  { %v654_v18 = vpop.eup %653 }
 0x127   :  { %v107_v20 = vmul.f32 %v654_v18, %v770_v0  ;;  %v219_v0 = vld [vmem:[%s968_s3 + $0x28] sm:$0xff]  ;;  %v350_v18 = vld [vmem:[#allocation4 + $0xa0] sm:$0xff] }
 0x129   :  { %v108_v21 = vmul.f32 %v107_v20, %v79_v19  ;;  %v355_v20 = vld [vmem:[#allocation4 + $0xc8] sm:$0xff] }
 0x12a   :  { %v656_v23 = vpop.eup %655 }
 0x12b   :  { %v77_v22 = vmul.f32 %v656_v23, %v775_v1  ;;  %109 = vst.msk [vmem:[#allocation2 + $0x8] sm:$0xff] %vm82_vm1, %v108_v21  ;;  %v221_v1 = vld [vmem:[%s968_s3 + $0x38] sm:$0xff]  ;;  %v357_v21 = vld [vmem:[#allocation4 + $0xd8] sm:$0xff] }
 0x12c   :  { %v567_v29 = vpack.c.bf16 %v221_v1, %v219_v0 }
 0x12d   :  { %v81_v24 = vmul.f32 %v79_v19, %v77_v22  ;;  %v352_v19 = vld [vmem:[#allocation4 + $0xb0] sm:$0xff]  ;;  %v603_v22 = vpack.c.bf16 %v357_v21, %v355_v20  ;;  %v232_v20 = vlaneseq }
 0x12e   :  { %v601_v23 = vpack.c.bf16 %v352_v19, %v350_v18  ;;  %v392_v18 = vld [vmem:[#allocation4 + $0x1f0] sm:$0xff] }
 0x12f   :  { %83 = vst.msk [vmem:[#allocation2] sm:$0xff] %vm82_vm1, %v81_v24  ;;  %v354_v24 = vld [vmem:[#allocation4 + $0xc0] sm:$0xff]  ;;  %v641_v19 = vpack.c.bf16 %v392_v18, %v390_v17  ;;  %v233_v21 = vshrl.u32 %v232_v20, 7 }
 0x130   :  { %602 = vmatpush1.bf16.msra.mxu1 %v601_v23  ;;  %v605_v0 = vpack.c.bf16 %v356_v25, %v354_v24 }
 0x131   :  { %604 = vmatprep.subr.bf16.mxu1 %v603_v22  ;;  %v234_v23 = vsub.s32 0, %v233_v21  ;;  %v230_v22 = vld [vmem:[%s969_s4] sm:$0x3]  ;;  %v238_v24 = vsub.s32 1, %v233_v21 }
 0x132   :  { %v111_v27 = vld [vmem:[#allocation2 + $0x8] sm:$0xff] }
 0x133   :  { %208 = vmatprep.mubr.f32.mxu0 %v111_v27  ;;  %v361_v27 = vld [vmem:[#allocation4 + $0xf8] sm:$0xff]  ;;  %v235_v25 = vrot.slane %v230_v22, %v234_v23 }
 0x134   :  { %v607_v1 = vpack.c.bf16 %v361_v27, %v359_v26  ;;  %606 = vmatpush1.bf16.msra.mxu1 %v605_v0  ;;  %v239_v26 = vrot.slane %v230_v22, %v238_v24 }
 0x136   :  { %v110_v32 = vld [vmem:[#allocation2] sm:$0xff]  ;;  %608 = vmatprep.subr.bf16.mxu1 %v607_v1 }
 0x137   :  { %209 = vmatmul.mubr.f32.vlgmr.msra.gmra.mrb[0].mxu0 %v110_v32 }
 0x138   :  { %566 = vmatpush1.bf16.msra.mxu0 %v565_v28  ;;  %309 = vmatprep.mubr.f32.mxu0 %v713_v46  ;;  %v358_v28 = vld [vmem:[#allocation4 + $0xe0] sm:$0xff] }
 0x139   :  { %568 = vmatprep.subr.bf16.mxu0 %v567_v29  ;;  %v360_v29 = vld [vmem:[#allocation4 + $0xf0] sm:$0xff]  ;;  %v370_v46 = vld [vmem:[#allocation4 + $0x140] sm:$0xff] }
 0x13a   :  { %v609_v32 = vpack.c.bf16 %v360_v29, %v358_v28  ;;  %v621_v48 = vpack.c.bf16 %v372_v47, %v370_v46 }
 0x13c   :  { %570 = vmatpush1.bf16.msra.mxu0 %v569_v35  ;;  %v364_v35 = vld [vmem:[#allocation4 + $0x110] sm:$0xff]  ;;  %610 = vmatpush1.bf16.msra.mxu1 %v609_v32 }
 0x13d   :  { %572 = vmatprep.subr.bf16.mxu0 %v571_v36  ;;  %v367_v36 = vld [vmem:[#allocation4 + $0x128] sm:$0xff]  ;;  %v613_v38 = vpack.c.bf16 %v364_v35, %v362_v34  ;;  %612 = vmatprep.subr.bf16.mxu1 %v611_v33 }
 0x140   :  { %574 = vmatpush1.bf16.msra.mxu0 %v573_v39  ;;  %v615_v39 = vpack.c.bf16 %v369_v37, %v367_v36  ;;  %614 = vmatpush1.bf16.msra.mxu1 %v613_v38 }
 0x141   :  { %576 = vmatprep.subr.bf16.mxu0 %v575_v42  ;;  %v371_v42 = vld [vmem:[#allocation4 + $0x148] sm:$0xff] }
 0x142   :  { %616 = vmatprep.subr.bf16.mxu1 %v615_v39  ;;  %v394_v39 = vld [vmem:[%s971_s6] sm:$0x3] }
 0x143   :  { %v399_v40 = vrot.slane %v394_v39, %v234_v23  ;;  %v403_v41 = vrot.slane %v394_v39, %v238_v24 }
 0x144   :  { %578 = vmatpush1.bf16.msra.mxu0 %v577_v45  ;;  %v619_v45 = vpack.c.bf16 %v373_v43, %v371_v42  ;;  %618 = vmatpush1.bf16.msra.mxu1 %v617_v44 }
 0x146   :  { %620 = vmatprep.subr.bf16.mxu1 %v619_v45 }
 0x148   :  { %622 = vmatpush1.bf16.msra.mxu1 %v621_v48 }
 0x149   :  { %624 = vmatprep.subr.bf16.mxu1 %v623_v54 }
 0x14c   :  { %626 = vmatpush1.bf16.msra.mxu1 %v625_v57 }
 0x14d   :  { %628 = vmatprep.subr.bf16.mxu1 %v627_v60 }
 0x150   :  { %630 = vmatpush1.bf16.msra.mxu1 %v629_v63 }
 0x151   :  { %632 = vmatprep.subr.bf16.mxu1 %v631_v4 }
 0x154   :  { %634 = vmatpush1.bf16.msra.mxu1 %v633_v7 }
 0x155   :  { %636 = vmatprep.subr.bf16.mxu1 %v635_v10 }
 0x158   :  { %638 = vmatpush1.bf16.msra.mxu1 %v637_v13 }
 0x159   :  { %640 = vmatprep.subr.bf16.mxu1 %v639_v16 }
 0x15c   :  { %642 = vmatpush1.bf16.msra.mxu1 %v641_v19 }
 0x20a   :  { %v528_v49 = vpop.f32.mrb[0].mxu0 }
 0x20b   :  { %v529_v50 = vpop.f32.mrb[1].mxu0 }
 0x20c   :  { %v530_v51 = vadd.f32 %v529_v50, %v528_v49 }
 0x20e   :  { %495 = vmatmul.mubr.msk.f32.vlgmr.msra.gmra.mrb[2].mxu0 %vm54_vm0, %v530_v51 }
 0x2e1   :  { %v311_v27 = vpop.f32.mrb[2].mxu0 }
 0x2e2   :  { %v312_v0 = vadd.f32 %v311_v27, %v235_v25  ;;  %v313_v1 = vpop.f32.mrb[3].mxu0 }
 0x2e3   :  { %v314_v28 = vadd.f32 %v313_v1, %v239_v26 }
 0x2e4   :  { %v318_v29 = vmul.f32 0.70710677, %v312_v0  ;;  %v316_v36 = vmul.f32 0.5, %v312_v0 }
 0x2e5   :  { %v319_v30 = vmul.f32 0.70710677, %v314_v28  ;;  %v317_v34 = vmul.f32 0.5, %v314_v28 }
 0x2e6   :  { %657 = verf.f32 %v318_v29 }
 0x2e7   :  { %659 = verf.f32 %v319_v30 }
 0x2f0   :  { %v658_v31 = vpop.eup %657 }
 0x2f1   :  { %v660_v32 = vpop.eup %659  ;;  %v322_v33 = vadd.f32 1.0, %v658_v31 }
 0x2f2   :  { %v323_v35 = vadd.f32 1.0, %v660_v32 }
 0x2f3   :  { %v324_v38 = vmul.f32 %v322_v33, %v316_v36 }
 0x2f4   :  { %v325_v37 = vmul.f32 %v323_v35, %v317_v34 }
 0x2f6   :  { %470 = vmatprep.mubr.f32.mxu1 %v325_v37 }
 0x2f7   :  { %471 = vmatmul.mubr.f32.vlgmr.msra.gmra.mrb[0].mxu1 %v324_v38 }
 0x3ca   :  { %v472_v42 = vpop.f32.mrb[0].mxu1 }
 0x3cb   :  { %v473_v43 = vadd.f32 %v472_v42, %v399_v40  ;;  %v474_v44 = vpop.f32.mrb[1].mxu1 }
 0x3cc   :  { %v475_v45 = vadd.f32 %v474_v44, %v403_v41 }
 0x3cd   :  { %477 = vst [vmem:[#allocation7] sm:$0xff] %v473_v43 }
 0x3ce   :  { %478 = vst [vmem:[#allocation7 + $0x8] sm:$0xff] %v475_v45 }
 0x3cf   :  { %694 = shalt.err (!%p691_p12)
}
 0x3d0   :  { %s695_s0 = scalar_lea.hbm %s972_s7, 256 }
 0x3d1   :  { %p696_p13 = scmp.ne.s32.totalorder %s972_s7, %s695_s0  ;;  %p699_p0 = scmp.lt.u32.totalorder %s695_s0, %s972_s7 }
 0x3d3   :  { %p701_p1 = pnand %p699_p0, %p696_p13 }
 0x3d5   :  { %704 = shalt.err (!%p701_p1)
}
 0x3d6   :  { %488 = dma.vmem_to_hbm [thread:$0]  %s486_s16, 256, %s972_s7, [#allocation6]  }
 0x3d7   :  { %707 = dma.done.wait [#allocation6], 256  }
 0x3d8   :  { %708 = vsyncadd [#allocation6], 4294967040 }
 0x3d9   :  { %492 = vsyncpa [#allocation5], 1 }
 0x3da   :  { %493 = vsyncpa [#allocation6], 1 }

</bundles_post_ra>
